<compile_context>
chip_gen: v6e
topology: v6e:2x2x1
jax: 0.10.0
libtpu: 0.0.40
codegen_flags: <defaults>
</compile_context>

<pallas_src>
import jax
import jax.numpy as jnp
from jax.experimental import pallas as pl
from jax.experimental.pallas import tpu as pltpu

# -------------------- small, module-consistent config --------------------
TRANSFORMER_BLOCKS = 2
IMAGE_SIZE = 32
PATCH_SIZE = 16
NUM_CHANNELS = 3
EMBED = 32           # embedded_size
HEADS = 4            # attention_heads (EMBED % HEADS == 0)
MLP_HIDDEN = 16      # mlp_hidden_size
HEAD_DIM = EMBED // HEADS
LN_EPS = 1e-5
BATCH = 2

GRID_P = IMAGE_SIZE // PATCH_SIZE            # patches per side
NUM_PATCHES = GRID_P * GRID_P                # sequence_length before cls
SEQ = NUM_PATCHES + 1                        # +cls token
PATCH_DIM = NUM_CHANNELS * PATCH_SIZE * PATCH_SIZE


# ============================ fused Pallas kernel =============================

def _vit_kernel(xp_ref, wproj_ref, bproj_ref, cls_ref, pos_ref,
                ln1g_ref, ln1b_ref,
                wq_ref, bq_ref, wk_ref, bk_ref, wv_ref, bv_ref,
                wo_ref, bo_ref,
                ln2g_ref, ln2b_ref,
                w1_ref, b1_ref, w2_ref, b2_ref,
                o_ref):
    """One grid step == one image.

    xp_ref : (P, C*ps*ps)  flattened patches of this image
    weights: stacked over blocks (leading dim = TRANSFORMER_BLOCKS),
             Q/K/V/O head-major: (L, H, Dh, E)
    o_ref  : (S, E)        output tile, also used as the assembly buffer
    """
    S, E = o_ref.shape
    L, H = wq_ref.shape[0], wq_ref.shape[1]

    # ---- patch embedding: Conv2d(kernel==stride) as one (P, CK) @ (CK, E) ----
    emb = jnp.dot(xp_ref[...], wproj_ref[...],
                  preferred_element_type=jnp.float32) + bproj_ref[...]

    # ---- token assembly directly in the output tile (VMEM resident) ----
    o_ref[0:1, :] = cls_ref[...]                     # cls token
    o_ref[1:, :] = emb + pos_ref[...]                # patches + positional enc.
    x = o_ref[...]                                   # (S, E) activation tile

    def layernorm(v, g, b):
        mu = jnp.mean(v, axis=-1, keepdims=True)
        var = jnp.mean((v - mu) ** 2, axis=-1, keepdims=True)
        return (v - mu) * jax.lax.rsqrt(var + LN_EPS) * g + b

    # ---- transformer blocks (statically unrolled over L) ----
    for l in range(L):
        wq, bq = wq_ref[l], bq_ref[l]
        wk, bk = wk_ref[l], bk_ref[l]
        wv, bv = wv_ref[l], bv_ref[l]
        wo, bo = wo_ref[l], bo_ref[l]

        # LayerNorm 1 + head-batched Q/K/V projections (no lane slicing).
        xn = layernorm(x, ln1g_ref[l], ln1b_ref[l])
        xb = jnp.broadcast_to(xn, (H, S, E))                             # (H,S,E)
        q = jnp.einsum('hse,hde->hsd', xb, wq,
                       preferred_element_type=jnp.float32) + bq          # scale folded in wq
        k = jnp.einsum('hse,hde->hsd', xb, wk,
                       preferred_element_type=jnp.float32) + bk
        v = jnp.einsum('hse,hde->hsd', xb, wv,
                       preferred_element_type=jnp.float32) + bv

        # Attention (heads batched), numerically-stable softmax, EUP reciprocal.
        s = jnp.einsum('hsd,htd->hst', q, k,
                       preferred_element_type=jnp.float32)               # (H,S,S)
        s = s - jnp.max(s, axis=-1, keepdims=True)
        p = jnp.exp(s)
        p = p * pl.reciprocal(jnp.sum(p, axis=-1, keepdims=True), approx=True)
        ctx = jnp.einsum('hst,htd->hsd', p, v,
                         preferred_element_type=jnp.float32)             # (H,S,Dh)

        # Output projection == sum over heads of (S, Dh) @ (Dh, E).
        proj = jnp.einsum('hsd,hde->hse', ctx, wo,
                          preferred_element_type=jnp.float32)            # (H,S,E)
        x = x + jnp.sum(proj, axis=0) + bo                               # residual 1

        # LayerNorm 2 + 2-layer MLP (ReLU).
        xn2 = layernorm(x, ln2g_ref[l], ln2b_ref[l])
        h1 = jnp.maximum(
            jnp.dot(xn2, w1_ref[l], preferred_element_type=jnp.float32)
            + b1_ref[l], 0.0)
        x = x + jnp.dot(h1, w2_ref[l],
                        preferred_element_type=jnp.float32) + b2_ref[l]  # residual 2

    o_ref[...] = x


# ============================ pallas_call wrapper =============================

def _replicated_spec(a):
    """Full-array block, constant block index -> DMA'd once, reused every step."""
    zeros = (0,) * a.ndim
    return pl.BlockSpec(a.shape, lambda b: zeros)


def vit_pallas(xp, params):
    B = xp.shape[0]
    blk = params["blocks"]
    weights = (params["w_proj"], params["b_proj"], params["cls_token"],
               params["pos_embed"],
               blk["ln1_g"], blk["ln1_b"],
               blk["w_q"], blk["b_q"], blk["w_k"], blk["b_k"],
               blk["w_v"], blk["b_v"],
               blk["w_o"], blk["b_o"],
               blk["ln2_g"], blk["ln2_b"],
               blk["w1"], blk["b1"], blk["w2"], blk["b2"])

    in_specs = [pl.BlockSpec((None, NUM_PATCHES, PATCH_DIM),
                             lambda b: (b, 0, 0))]            # per-image patches
    in_specs += [_replicated_spec(w) for w in weights]

    return pl.pallas_call(
        _vit_kernel,
        grid=(B,),
        in_specs=in_specs,
        out_specs=pl.BlockSpec((None, SEQ, EMBED), lambda b: (b, 0, 0)),
        out_shape=jax.ShapeDtypeStruct((B, SEQ, EMBED), jnp.float32),
        compiler_params=pltpu.CompilerParams(
            dimension_semantics=("parallel",)),               # megacore over batch
    )(xp, *weights)


# ============================ parameter init (deterministic) =============================

def sinusoidal_positional_encoding(seq_len, d_model):
    pos = jnp.arange(seq_len, dtype=jnp.float32)[:, None]
    i = jnp.arange(d_model // 2, dtype=jnp.float32)[None, :]
    div = jnp.exp(-(jnp.log(10000.0)) * (2.0 * i) / d_model)
    pe = jnp.zeros((seq_len, d_model), jnp.float32)
    pe = pe.at[:, 0::2].set(jnp.sin(pos * div))
    pe = pe.at[:, 1::2].set(jnp.cos(pos * div))
    return pe


def init_params(key):
    def nrm(k, shape, scale=0.02):
        return (scale * jax.random.normal(k, shape)).astype(jnp.float32)

    k_conv, k_bias, k_cls, k_blk = jax.random.split(key, 4)
    params = {
        # Conv2d(num_channels, embedded_size, patch_size, patch_size) as matmul
        "w_proj": nrm(k_conv, (EMBED, NUM_CHANNELS, PATCH_SIZE, PATCH_SIZE))
                  .reshape(EMBED, PATCH_DIM).T,                         # (CK, E)
        "b_proj": nrm(k_bias, (1, EMBED)),
        "cls_token": jax.random.normal(k_cls, (1, EMBED)).astype(jnp.float32),
        "pos_embed": sinusoidal_positional_encoding(NUM_PATCHES, EMBED),
    }

    attn_scale = 1.0 / (HEAD_DIM ** 0.5)
    names = ("ln1_g", "ln1_b", "w_q", "b_q", "w_k", "b_k", "w_v", "b_v",
             "w_o", "b_o", "ln2_g", "ln2_b", "w1", "b1", "w2", "b2")
    acc = {n: [] for n in names}

    def head_major(w):           # (E, E) column-block per head -> (H, Dh, E)
        return w.T.reshape(HEADS, HEAD_DIM, EMBED)

    for kb in jax.random.split(k_blk, TRANSFORMER_BLOCKS):
        kq, ko, k1, k2 = jax.random.split(kb, 4)
        w_qkv = nrm(kq, (EMBED, 3 * EMBED))
        # Fold the 1/sqrt(Dh) attention scale into the Q projection weights.
        acc["w_q"].append(head_major(w_qkv[:, 0:EMBED]) * attn_scale)
        acc["w_k"].append(head_major(w_qkv[:, EMBED:2 * EMBED]))
        acc["w_v"].append(head_major(w_qkv[:, 2 * EMBED:3 * EMBED]))
        for n in ("b_q", "b_k", "b_v"):
            acc[n].append(jnp.zeros((HEADS, 1, HEAD_DIM), jnp.float32))
        acc["w_o"].append(nrm(ko, (EMBED, EMBED)).reshape(HEADS, HEAD_DIM, EMBED))
        acc["b_o"].append(jnp.zeros((1, EMBED), jnp.float32))
        acc["ln1_g"].append(jnp.ones((1, EMBED), jnp.float32))
        acc["ln1_b"].append(jnp.zeros((1, EMBED), jnp.float32))
        acc["ln2_g"].append(jnp.ones((1, EMBED), jnp.float32))
        acc["ln2_b"].append(jnp.zeros((1, EMBED), jnp.float32))
        acc["w1"].append(nrm(k1, (EMBED, MLP_HIDDEN)))
        acc["b1"].append(jnp.zeros((1, MLP_HIDDEN), jnp.float32))
        acc["w2"].append(nrm(k2, (MLP_HIDDEN, EMBED)))
        acc["b2"].append(jnp.zeros((1, EMBED), jnp.float32))

    params["blocks"] = {n: jnp.stack(v, axis=0) for n, v in acc.items()}
    return params


# ============================ forward pass =============================

def patchify_nchw(x):
    """(B, C, H, W) -> (B, P, C*ps*ps); patches row-major over (Hp, Wp),
    per-patch features ordered (C, ph, pw) to match Conv2d weight layout."""
    B, C, H, W = x.shape
    hp, wp = H // PATCH_SIZE, W // PATCH_SIZE
    x = x.reshape(B, C, hp, PATCH_SIZE, wp, PATCH_SIZE)
    x = x.transpose(0, 2, 4, 1, 3, 5)                    # (B, hp, wp, C, ps, ps)
    return x.reshape(B, hp * wp, C * PATCH_SIZE * PATCH_SIZE)


@jax.jit
def vit_forward(x, params):
    xp = patchify_nchw(x.astype(jnp.float32))            # (B, P, CK); fused by XLA
    return vit_pallas(xp, params)                        # single Pallas launch


# ============================ pure-JAX reference (correctness check) =============================

def vit_reference(x, params):
    hi = jax.lax.Precision.HIGHEST
    blk = params["blocks"]
    xp = patchify_nchw(x.astype(jnp.float32))
    B = xp.shape[0]
    emb = jnp.einsum('bpc,ce->bpe', xp, params["w_proj"], precision=hi) \
        + params["b_proj"]
    emb = emb + params["pos_embed"]
    cls = jnp.broadcast_to(params["cls_token"][None], (B, 1, EMBED))
    y = jnp.concatenate([cls, emb], axis=1)

    def layernorm(v, g, b):
        mu = jnp.mean(v, axis=-1, keepdims=True)
        var = jnp.mean((v - mu) ** 2, axis=-1, keepdims=True)
        return (v - mu) * jax.lax.rsqrt(var + LN_EPS) * g + b

    for l in range(TRANSFORMER_BLOCKS):
        xn = layernorm(y, blk["ln1_g"][l], blk["ln1_b"][l])
        q = jnp.einsum('bse,hde->bhsd', xn, blk["w_q"][l], precision=hi) + blk["b_q"][l]
        k = jnp.einsum('bse,hde->bhsd', xn, blk["w_k"][l], precision=hi) + blk["b_k"][l]
        v = jnp.einsum('bse,hde->bhsd', xn, blk["w_v"][l], precision=hi) + blk["b_v"][l]
        s = jnp.einsum('bhsd,bhtd->bhst', q, k, precision=hi)
        p = jax.nn.softmax(s, axis=-1)
        ctx = jnp.einsum('bhst,bhtd->bhsd', p, v, precision=hi)
        attn = jnp.einsum('bhsd,hde->bse', ctx, blk["w_o"][l], precision=hi) \
             + blk["b_o"][l]
        y = y + attn
        xn2 = layernorm(y, blk["ln2_g"][l], blk["ln2_b"][l])
        h1 = jax.nn.relu(
            jnp.einsum('bse,eh->bsh', xn2, blk["w1"][l], precision=hi) + blk["b1"][l])
        y = y + jnp.einsum('bsh,he->bse', h1, blk["w2"][l], precision=hi) + blk["b2"][l]
    return y


# ============================ main =============================

if __name__ == "__main__":
    key = jax.random.PRNGKey(0)
    k_param, k_x = jax.random.split(key)
    params = init_params(k_param)

    x = jax.random.normal(k_x, (BATCH, NUM_CHANNELS, IMAGE_SIZE, IMAGE_SIZE),
                          dtype=jnp.float32)             # NCHW

    y = vit_forward(x, params)
    y = jax.block_until_ready(y)
    assert y.shape == (BATCH, SEQ, EMBED), y.shape
    assert bool(jnp.all(jnp.isfinite(y)))

    # Correctness vs. pure-JAX reference (tolerance covers MXU f32 precision
    # and the approx-reciprocal softmax).
    y_ref = vit_reference(x, params)
    err = float(jnp.max(jnp.abs(y - y_ref)))
    assert err < 5e-2, f"max abs err vs reference: {err}"

    print("KERNEL_OK")
</pallas_src>

<mosaic_0001>
module attributes {stable_mosaic.version = 11 : i64} {
  func.func @_vit_kernel(%arg0: i32, %arg1: memref<1x4x768xf32, #tpu.memory_space<vmem>>, %arg2: memref<768x32xf32, #tpu.memory_space<vmem>>, %arg3: memref<1x32xf32, #tpu.memory_space<vmem>>, %arg4: memref<1x32xf32, #tpu.memory_space<vmem>>, %arg5: memref<4x32xf32, #tpu.memory_space<vmem>>, %arg6: memref<2x1x32xf32, #tpu.memory_space<vmem>>, %arg7: memref<2x1x32xf32, #tpu.memory_space<vmem>>, %arg8: memref<2x4x8x32xf32, #tpu.memory_space<vmem>>, %arg9: memref<2x4x1x8xf32, #tpu.memory_space<vmem>>, %arg10: memref<2x4x8x32xf32, #tpu.memory_space<vmem>>, %arg11: memref<2x4x1x8xf32, #tpu.memory_space<vmem>>, %arg12: memref<2x4x8x32xf32, #tpu.memory_space<vmem>>, %arg13: memref<2x4x1x8xf32, #tpu.memory_space<vmem>>, %arg14: memref<2x4x8x32xf32, #tpu.memory_space<vmem>>, %arg15: memref<2x1x32xf32, #tpu.memory_space<vmem>>, %arg16: memref<2x1x32xf32, #tpu.memory_space<vmem>>, %arg17: memref<2x1x32xf32, #tpu.memory_space<vmem>>, %arg18: memref<2x32x16xf32, #tpu.memory_space<vmem>>, %arg19: memref<2x1x16xf32, #tpu.memory_space<vmem>>, %arg20: memref<2x16x32xf32, #tpu.memory_space<vmem>>, %arg21: memref<2x1x32xf32, #tpu.memory_space<vmem>>, %arg22: memref<1x5x32xf32, #tpu.memory_space<vmem>>) attributes {dimension_semantics = [#tpu.dimension_semantics<parallel>], iteration_bounds = array<i64: 2>, scalar_prefetch = 0 : i64, scratch_operands = 0 : i64, tpu.core_type = #tpu.core_type<tc>, window_params = [{transform_indices = @transform_0, window_bounds = array<i64: 1, 4, 768>}, {pipeline_mode = #tpu.pipeline_mode<synchronous>, transform_indices = @transform_1, window_bounds = array<i64: 768, 32>}, {pipeline_mode = #tpu.pipeline_mode<synchronous>, transform_indices = @transform_2, window_bounds = array<i64: 1, 32>}, {pipeline_mode = #tpu.pipeline_mode<synchronous>, transform_indices = @transform_3, window_bounds = array<i64: 1, 32>}, {pipeline_mode = #tpu.pipeline_mode<synchronous>, transform_indices = @transform_4, window_bounds = array<i64: 4, 32>}, {pipeline_mode = #tpu.pipeline_mode<synchronous>, transform_indices = @transform_5, window_bounds = array<i64: 2, 1, 32>}, {pipeline_mode = #tpu.pipeline_mode<synchronous>, transform_indices = @transform_6, window_bounds = array<i64: 2, 1, 32>}, {pipeline_mode = #tpu.pipeline_mode<synchronous>, transform_indices = @transform_7, window_bounds = array<i64: 2, 4, 8, 32>}, {pipeline_mode = #tpu.pipeline_mode<synchronous>, transform_indices = @transform_8, window_bounds = array<i64: 2, 4, 1, 8>}, {pipeline_mode = #tpu.pipeline_mode<synchronous>, transform_indices = @transform_9, window_bounds = array<i64: 2, 4, 8, 32>}, {pipeline_mode = #tpu.pipeline_mode<synchronous>, transform_indices = @transform_10, window_bounds = array<i64: 2, 4, 1, 8>}, {pipeline_mode = #tpu.pipeline_mode<synchronous>, transform_indices = @transform_11, window_bounds = array<i64: 2, 4, 8, 32>}, {pipeline_mode = #tpu.pipeline_mode<synchronous>, transform_indices = @transform_12, window_bounds = array<i64: 2, 4, 1, 8>}, {pipeline_mode = #tpu.pipeline_mode<synchronous>, transform_indices = @transform_13, window_bounds = array<i64: 2, 4, 8, 32>}, {pipeline_mode = #tpu.pipeline_mode<synchronous>, transform_indices = @transform_14, window_bounds = array<i64: 2, 1, 32>}, {pipeline_mode = #tpu.pipeline_mode<synchronous>, transform_indices = @transform_15, window_bounds = array<i64: 2, 1, 32>}, {pipeline_mode = #tpu.pipeline_mode<synchronous>, transform_indices = @transform_16, window_bounds = array<i64: 2, 1, 32>}, {pipeline_mode = #tpu.pipeline_mode<synchronous>, transform_indices = @transform_17, window_bounds = array<i64: 2, 32, 16>}, {pipeline_mode = #tpu.pipeline_mode<synchronous>, transform_indices = @transform_18, window_bounds = array<i64: 2, 1, 16>}, {pipeline_mode = #tpu.pipeline_mode<synchronous>, transform_indices = @transform_19, window_bounds = array<i64: 2, 16, 32>}, {pipeline_mode = #tpu.pipeline_mode<synchronous>, transform_indices = @transform_20, window_bounds = array<i64: 2, 1, 32>}, {transform_indices = @transform_21, window_bounds = array<i64: 1, 5, 32>}]} {
    %c0 = arith.constant 0 : index
    %c0_0 = arith.constant 0 : index
    %c0_1 = arith.constant 0 : index
    %0 = vector.load %arg1[%c0, %c0_0, %c0_1] : memref<1x4x768xf32, #tpu.memory_space<vmem>>, vector<1x4x768xf32>
    %1 = vector.shape_cast %0 : vector<1x4x768xf32> to vector<4x768xf32>
    %c0_2 = arith.constant 0 : index
    %c0_3 = arith.constant 0 : index
    %2 = vector.load %arg2[%c0_2, %c0_3] : memref<768x32xf32, #tpu.memory_space<vmem>>, vector<768x32xf32>
    %cst = arith.constant dense<0.000000e+00> : vector<4x32xf32>
    %3 = tpu.matmul %1, %2, %cst {dimension_numbers = #tpu.dot_dimension_numbers<[1], [0], [0], [1], [0, 0, 1, 1], [], []>} : vector<4x768xf32>, vector<768x32xf32>, vector<4x32xf32> -> vector<4x32xf32>
    %c0_4 = arith.constant 0 : index
    %c0_5 = arith.constant 0 : index
    %4 = vector.load %arg3[%c0_4, %c0_5] : memref<1x32xf32, #tpu.memory_space<vmem>>, vector<1x32xf32>
    %5 = vector.broadcast %4 : vector<1x32xf32> to vector<4x32xf32>
    %6 = arith.addf %3, %5 : vector<4x32xf32>
    %c0_6 = arith.constant 0 : index
    %c0_7 = arith.constant 0 : index
    %7 = vector.load %arg4[%c0_6, %c0_7] : memref<1x32xf32, #tpu.memory_space<vmem>>, vector<1x32xf32>
    %c0_8 = arith.constant 0 : index
    %c0_9 = arith.constant 0 : index
    %c0_10 = arith.constant 0 : index
    %8 = vector.load %arg22[%c0_8, %c0_9, %c0_10] : memref<1x5x32xf32, #tpu.memory_space<vmem>>, vector<1x1x32xf32>
    %9 = vector.shape_cast %8 : vector<1x1x32xf32> to vector<1x32xf32>
    %10 = vector.shape_cast %7 : vector<1x32xf32> to vector<1x1x32xf32>
    tpu.vector_store %arg22[%c0_8, %c0_9, %c0_10], %10 {strides = array<i32>} : memref<1x5x32xf32, #tpu.memory_space<vmem>>, vector<1x1x32xf32>,
    %c0_11 = arith.constant 0 : index
    %c0_12 = arith.constant 0 : index
    %11 = vector.load %arg5[%c0_11, %c0_12] : memref<4x32xf32, #tpu.memory_space<vmem>>, vector<4x32xf32>
    %12 = arith.addf %6, %11 : vector<4x32xf32>
    %c0_13 = arith.constant 0 : index
    %c1 = arith.constant 1 : index
    %c0_14 = arith.constant 0 : index
    %13 = vector.load %arg22[%c0_13, %c1, %c0_14] : memref<1x5x32xf32, #tpu.memory_space<vmem>>, vector<1x4x32xf32>
    %14 = vector.shape_cast %13 : vector<1x4x32xf32> to vector<4x32xf32>
    %15 = vector.shape_cast %12 : vector<4x32xf32> to vector<1x4x32xf32>
    tpu.vector_store %arg22[%c0_13, %c1, %c0_14], %15 {strides = array<i32>} : memref<1x5x32xf32, #tpu.memory_space<vmem>>, vector<1x4x32xf32>,
    %c0_15 = arith.constant 0 : index
    %c0_16 = arith.constant 0 : index
    %c0_17 = arith.constant 0 : index
    %16 = vector.load %arg22[%c0_15, %c0_16, %c0_17] : memref<1x5x32xf32, #tpu.memory_space<vmem>>, vector<1x5x32xf32>
    %17 = vector.shape_cast %16 : vector<1x5x32xf32> to vector<5x32xf32>
    %c0_18 = arith.constant 0 : index
    %c0_19 = arith.constant 0 : index
    %c0_20 = arith.constant 0 : index
    %c0_21 = arith.constant 0 : index
    %18 = vector.load %arg8[%c0_18, %c0_19, %c0_20, %c0_21] : memref<2x4x8x32xf32, #tpu.memory_space<vmem>>, vector<1x4x8x32xf32>
    %19 = vector.shape_cast %18 : vector<1x4x8x32xf32> to vector<4x8x32xf32>
    %c0_22 = arith.constant 0 : index
    %c0_23 = arith.constant 0 : index
    %c0_24 = arith.constant 0 : index
    %c0_25 = arith.constant 0 : index
    %20 = vector.load %arg9[%c0_22, %c0_23, %c0_24, %c0_25] : memref<2x4x1x8xf32, #tpu.memory_space<vmem>>, vector<1x4x1x8xf32>
    %21 = vector.shape_cast %20 : vector<1x4x1x8xf32> to vector<4x1x8xf32>
    %c0_26 = arith.constant 0 : index
    %c0_27 = arith.constant 0 : index
    %c0_28 = arith.constant 0 : index
    %c0_29 = arith.constant 0 : index
    %22 = vector.load %arg10[%c0_26, %c0_27, %c0_28, %c0_29] : memref<2x4x8x32xf32, #tpu.memory_space<vmem>>, vector<1x4x8x32xf32>
    %23 = vector.shape_cast %22 : vector<1x4x8x32xf32> to vector<4x8x32xf32>
    %c0_30 = arith.constant 0 : index
    %c0_31 = arith.constant 0 : index
    %c0_32 = arith.constant 0 : index
    %c0_33 = arith.constant 0 : index
    %24 = vector.load %arg11[%c0_30, %c0_31, %c0_32, %c0_33] : memref<2x4x1x8xf32, #tpu.memory_space<vmem>>, vector<1x4x1x8xf32>
    %25 = vector.shape_cast %24 : vector<1x4x1x8xf32> to vector<4x1x8xf32>
    %c0_34 = arith.constant 0 : index
    %c0_35 = arith.constant 0 : index
    %c0_36 = arith.constant 0 : index
    %c0_37 = arith.constant 0 : index
    %26 = vector.load %arg12[%c0_34, %c0_35, %c0_36, %c0_37] : memref<2x4x8x32xf32, #tpu.memory_space<vmem>>, vector<1x4x8x32xf32>
    %27 = vector.shape_cast %26 : vector<1x4x8x32xf32> to vector<4x8x32xf32>
    %c0_38 = arith.constant 0 : index
    %c0_39 = arith.constant 0 : index
    %c0_40 = arith.constant 0 : index
    %c0_41 = arith.constant 0 : index
    %28 = vector.load %arg13[%c0_38, %c0_39, %c0_40, %c0_41] : memref<2x4x1x8xf32, #tpu.memory_space<vmem>>, vector<1x4x1x8xf32>
    %29 = vector.shape_cast %28 : vector<1x4x1x8xf32> to vector<4x1x8xf32>
    %c0_42 = arith.constant 0 : index
    %c0_43 = arith.constant 0 : index
    %c0_44 = arith.constant 0 : index
    %c0_45 = arith.constant 0 : index
    %30 = vector.load %arg14[%c0_42, %c0_43, %c0_44, %c0_45] : memref<2x4x8x32xf32, #tpu.memory_space<vmem>>, vector<1x4x8x32xf32>
    %31 = vector.shape_cast %30 : vector<1x4x8x32xf32> to vector<4x8x32xf32>
    %c0_46 = arith.constant 0 : index
    %c0_47 = arith.constant 0 : index
    %c0_48 = arith.constant 0 : index
    %32 = vector.load %arg15[%c0_46, %c0_47, %c0_48] : memref<2x1x32xf32, #tpu.memory_space<vmem>>, vector<1x1x32xf32>
    %33 = vector.shape_cast %32 : vector<1x1x32xf32> to vector<1x32xf32>
    %c0_49 = arith.constant 0 : index
    %c0_50 = arith.constant 0 : index
    %c0_51 = arith.constant 0 : index
    %34 = vector.load %arg6[%c0_49, %c0_50, %c0_51] : memref<2x1x32xf32, #tpu.memory_space<vmem>>, vector<1x1x32xf32>
    %35 = vector.shape_cast %34 : vector<1x1x32xf32> to vector<1x32xf32>
    %c0_52 = arith.constant 0 : index
    %c0_53 = arith.constant 0 : index
    %c0_54 = arith.constant 0 : index
    %36 = vector.load %arg7[%c0_52, %c0_53, %c0_54] : memref<2x1x32xf32, #tpu.memory_space<vmem>>, vector<1x1x32xf32>
    %37 = vector.shape_cast %36 : vector<1x1x32xf32> to vector<1x32xf32>
    %cst_55 = arith.constant dense<0.000000e+00> : vector<5xf32>
    %38 = vector.multi_reduction <add>, %17, %cst_55 [1] : vector<5x32xf32> to vector<5xf32>
    %39 = vector.shape_cast %38 : vector<5xf32> to vector<5x1xf32>
    %cst_56 = arith.constant 3.200000e+01 : f32
    %40 = vector.broadcast %cst_56 : f32 to vector<5x1xf32>
    %41 = arith.divf %39, %40 : vector<5x1xf32>
    %42 = vector.broadcast %41 : vector<5x1xf32> to vector<5x32xf32>
    %43 = arith.subf %17, %42 : vector<5x32xf32>
    %44 = arith.mulf %43, %43 : vector<5x32xf32>
    %cst_57 = arith.constant dense<0.000000e+00> : vector<5xf32>
    %45 = vector.multi_reduction <add>, %44, %cst_57 [1] : vector<5x32xf32> to vector<5xf32>
    %46 = vector.shape_cast %45 : vector<5xf32> to vector<5x1xf32>
    %cst_58 = arith.constant 3.200000e+01 : f32
    %47 = vector.broadcast %cst_58 : f32 to vector<5x1xf32>
    %48 = arith.divf %46, %47 : vector<5x1xf32>
    %49 = vector.broadcast %41 : vector<5x1xf32> to vector<5x32xf32>
    %50 = arith.subf %17, %49 : vector<5x32xf32>
    %cst_59 = arith.constant 9.99999974E-6 : f32
    %51 = vector.broadcast %cst_59 : f32 to vector<5x1xf32>
    %52 = arith.addf %48, %51 : vector<5x1xf32>
    %53 = math.rsqrt %52 : vector<5x1xf32>
    %54 = vector.broadcast %53 : vector<5x1xf32> to vector<5x32xf32>
    %55 = arith.mulf %50, %54 : vector<5x32xf32>
    %56 = vector.broadcast %35 : vector<1x32xf32> to vector<5x32xf32>
    %57 = arith.mulf %55, %56 : vector<5x32xf32>
    %58 = vector.broadcast %37 : vector<1x32xf32> to vector<5x32xf32>
    %59 = arith.addf %57, %58 : vector<5x32xf32>
    %60 = vector.shape_cast %59 : vector<5x32xf32> to vector<1x5x32xf32>
    %61 = vector.broadcast %60 : vector<1x5x32xf32> to vector<4x5x32xf32>
    "tpu.trace_start"() <{level = 10 : i32, message = "hse,hde->hsd"}> : () -> ()
    %cst_60 = arith.constant dense<0.000000e+00> : vector<4x5x8xf32>
    %62 = tpu.matmul %61, %19, %cst_60 {dimension_numbers = #tpu.dot_dimension_numbers<[2], [2], [1], [1], [0, 0, 0, 1, 1, 1], [0], [0]>} : vector<4x5x32xf32>, vector<4x8x32xf32>, vector<4x5x8xf32> -> vector<4x5x8xf32>
    "tpu.trace_stop"() : () -> ()
    %63 = vector.broadcast %21 : vector<4x1x8xf32> to vector<4x5x8xf32>
    %64 = arith.addf %62, %63 : vector<4x5x8xf32>
    "tpu.trace_start"() <{level = 10 : i32, message = "hse,hde->hsd"}> : () -> ()
    %cst_61 = arith.constant dense<0.000000e+00> : vector<4x5x8xf32>
    %65 = tpu.matmul %61, %23, %cst_61 {dimension_numbers = #tpu.dot_dimension_numbers<[2], [2], [1], [1], [0, 0, 0, 1, 1, 1], [0], [0]>} : vector<4x5x32xf32>, vector<4x8x32xf32>, vector<4x5x8xf32> -> vector<4x5x8xf32>
    "tpu.trace_stop"() : () -> ()
    %66 = vector.broadcast %25 : vector<4x1x8xf32> to vector<4x5x8xf32>
    %67 = arith.addf %65, %66 : vector<4x5x8xf32>
    "tpu.trace_start"() <{level = 10 : i32, message = "hse,hde->hsd"}> : () -> ()
    %cst_62 = arith.constant dense<0.000000e+00> : vector<4x5x8xf32>
    %68 = tpu.matmul %61, %27, %cst_62 {dimension_numbers = #tpu.dot_dimension_numbers<[2], [2], [1], [1], [0, 0, 0, 1, 1, 1], [0], [0]>} : vector<4x5x32xf32>, vector<4x8x32xf32>, vector<4x5x8xf32> -> vector<4x5x8xf32>
    "tpu.trace_stop"() : () -> ()
    %69 = vector.broadcast %29 : vector<4x1x8xf32> to vector<4x5x8xf32>
    %70 = arith.addf %68, %69 : vector<4x5x8xf32>
    "tpu.trace_start"() <{level = 10 : i32, message = "hsd,htd->hst"}> : () -> ()
    %cst_63 = arith.constant dense<0.000000e+00> : vector<4x5x5xf32>
    %71 = tpu.matmul %64, %67, %cst_63 {dimension_numbers = #tpu.dot_dimension_numbers<[2], [2], [1], [1], [0, 0, 0, 1, 1, 1], [0], [0]>} : vector<4x5x8xf32>, vector<4x5x8xf32>, vector<4x5x5xf32> -> vector<4x5x5xf32>
    "tpu.trace_stop"() : () -> ()
    %cst_64 = arith.constant dense<0xFF800000> : vector<4x5xf32>
    %72 = vector.multi_reduction <maximumf>, %71, %cst_64 [2] : vector<4x5x5xf32> to vector<4x5xf32>
    %73 = vector.shape_cast %72 : vector<4x5xf32> to vector<4x5x1xf32>
    %74 = vector.broadcast %73 : vector<4x5x1xf32> to vector<4x5x5xf32>
    %75 = arith.subf %71, %74 : vector<4x5x5xf32>
    %76 = math.exp %75 : vector<4x5x5xf32>
    %cst_65 = arith.constant dense<0.000000e+00> : vector<4x5xf32>
    %77 = vector.multi_reduction <add>, %76, %cst_65 [2] : vector<4x5x5xf32> to vector<4x5xf32>
    %78 = vector.shape_cast %77 : vector<4x5xf32> to vector<4x5x1xf32>
    %79 = tpu.reciprocal %78 {approx = true} : vector<4x5x1xf32> -> vector<4x5x1xf32>
    %80 = vector.broadcast %79 : vector<4x5x1xf32> to vector<4x5x5xf32>
    %81 = arith.mulf %76, %80 : vector<4x5x5xf32>
    "tpu.trace_start"() <{level = 10 : i32, message = "hst,htd->hsd"}> : () -> ()
    %cst_66 = arith.constant dense<0.000000e+00> : vector<4x5x8xf32>
    %82 = tpu.matmul %81, %70, %cst_66 {dimension_numbers = #tpu.dot_dimension_numbers<[2], [1], [1], [2], [0, 0, 0, 1, 1, 2], [0], [0]>} : vector<4x5x5xf32>, vector<4x5x8xf32>, vector<4x5x8xf32> -> vector<4x5x8xf32>
    "tpu.trace_stop"() : () -> ()
    "tpu.trace_start"() <{level = 10 : i32, message = "hsd,hde->hse"}> : () -> ()
    %cst_67 = arith.constant dense<0.000000e+00> : vector<4x5x32xf32>
    %83 = tpu.matmul %82, %31, %cst_67 {dimension_numbers = #tpu.dot_dimension_numbers<[2], [1], [1], [2], [0, 0, 0, 1, 1, 2], [0], [0]>} : vector<4x5x8xf32>, vector<4x8x32xf32>, vector<4x5x32xf32> -> vector<4x5x32xf32>
    "tpu.trace_stop"() : () -> ()
    %cst_68 = arith.constant dense<0.000000e+00> : vector<5x32xf32>
    %84 = vector.multi_reduction <add>, %83, %cst_68 [0] : vector<4x5x32xf32> to vector<5x32xf32>
    %85 = arith.addf %17, %84 : vector<5x32xf32>
    %86 = vector.broadcast %33 : vector<1x32xf32> to vector<5x32xf32>
    %87 = arith.addf %85, %86 : vector<5x32xf32>
    %c0_69 = arith.constant 0 : index
    %c0_70 = arith.constant 0 : index
    %c0_71 = arith.constant 0 : index
    %88 = vector.load %arg16[%c0_69, %c0_70, %c0_71] : memref<2x1x32xf32, #tpu.memory_space<vmem>>, vector<1x1x32xf32>
    %89 = vector.shape_cast %88 : vector<1x1x32xf32> to vector<1x32xf32>
    %c0_72 = arith.constant 0 : index
    %c0_73 = arith.constant 0 : index
    %c0_74 = arith.constant 0 : index
    %90 = vector.load %arg17[%c0_72, %c0_73, %c0_74] : memref<2x1x32xf32, #tpu.memory_space<vmem>>, vector<1x1x32xf32>
    %91 = vector.shape_cast %90 : vector<1x1x32xf32> to vector<1x32xf32>
    %cst_75 = arith.constant dense<0.000000e+00> : vector<5xf32>
    %92 = vector.multi_reduction <add>, %87, %cst_75 [1] : vector<5x32xf32> to vector<5xf32>
    %93 = vector.shape_cast %92 : vector<5xf32> to vector<5x1xf32>
    %cst_76 = arith.constant 3.200000e+01 : f32
    %94 = vector.broadcast %cst_76 : f32 to vector<5x1xf32>
    %95 = arith.divf %93, %94 : vector<5x1xf32>
    %96 = vector.broadcast %95 : vector<5x1xf32> to vector<5x32xf32>
    %97 = arith.subf %87, %96 : vector<5x32xf32>
    %98 = arith.mulf %97, %97 : vector<5x32xf32>
    %cst_77 = arith.constant dense<0.000000e+00> : vector<5xf32>
    %99 = vector.multi_reduction <add>, %98, %cst_77 [1] : vector<5x32xf32> to vector<5xf32>
    %100 = vector.shape_cast %99 : vector<5xf32> to vector<5x1xf32>
    %cst_78 = arith.constant 3.200000e+01 : f32
    %101 = vector.broadcast %cst_78 : f32 to vector<5x1xf32>
    %102 = arith.divf %100, %101 : vector<5x1xf32>
    %103 = vector.broadcast %95 : vector<5x1xf32> to vector<5x32xf32>
    %104 = arith.subf %87, %103 : vector<5x32xf32>
    %cst_79 = arith.constant 9.99999974E-6 : f32
    %105 = vector.broadcast %cst_79 : f32 to vector<5x1xf32>
    %106 = arith.addf %102, %105 : vector<5x1xf32>
    %107 = math.rsqrt %106 : vector<5x1xf32>
    %108 = vector.broadcast %107 : vector<5x1xf32> to vector<5x32xf32>
    %109 = arith.mulf %104, %108 : vector<5x32xf32>
    %110 = vector.broadcast %89 : vector<1x32xf32> to vector<5x32xf32>
    %111 = arith.mulf %109, %110 : vector<5x32xf32>
    %112 = vector.broadcast %91 : vector<1x32xf32> to vector<5x32xf32>
    %113 = arith.addf %111, %112 : vector<5x32xf32>
    %c0_80 = arith.constant 0 : index
    %c0_81 = arith.constant 0 : index
    %c0_82 = arith.constant 0 : index
    %114 = vector.load %arg18[%c0_80, %c0_81, %c0_82] : memref<2x32x16xf32, #tpu.memory_space<vmem>>, vector<1x32x16xf32>
    %115 = vector.shape_cast %114 : vector<1x32x16xf32> to vector<32x16xf32>
    %cst_83 = arith.constant dense<0.000000e+00> : vector<5x16xf32>
    %116 = tpu.matmul %113, %115, %cst_83 {dimension_numbers = #tpu.dot_dimension_numbers<[1], [0], [0], [1], [0, 0, 1, 1], [], []>} : vector<5x32xf32>, vector<32x16xf32>, vector<5x16xf32> -> vector<5x16xf32>
    %c0_84 = arith.constant 0 : index
    %c0_85 = arith.constant 0 : index
    %c0_86 = arith.constant 0 : index
    %117 = vector.load %arg19[%c0_84, %c0_85, %c0_86] : memref<2x1x16xf32, #tpu.memory_space<vmem>>, vector<1x1x16xf32>
    %118 = vector.shape_cast %117 : vector<1x1x16xf32> to vector<1x16xf32>
    %119 = vector.broadcast %118 : vector<1x16xf32> to vector<5x16xf32>
    %120 = arith.addf %116, %119 : vector<5x16xf32>
    %cst_87 = arith.constant 0.000000e+00 : f32
    %121 = vector.broadcast %cst_87 : f32 to vector<5x16xf32>
    %122 = arith.maximumf %120, %121 : vector<5x16xf32>
    %c0_88 = arith.constant 0 : index
    %c0_89 = arith.constant 0 : index
    %c0_90 = arith.constant 0 : index
    %123 = vector.load %arg20[%c0_88, %c0_89, %c0_90] : memref<2x16x32xf32, #tpu.memory_space<vmem>>, vector<1x16x32xf32>
    %124 = vector.shape_cast %123 : vector<1x16x32xf32> to vector<16x32xf32>
    %cst_91 = arith.constant dense<0.000000e+00> : vector<5x32xf32>
    %125 = tpu.matmul %122, %124, %cst_91 {dimension_numbers = #tpu.dot_dimension_numbers<[1], [0], [0], [1], [0, 0, 1, 1], [], []>} : vector<5x16xf32>, vector<16x32xf32>, vector<5x32xf32> -> vector<5x32xf32>
    %126 = arith.addf %87, %125 : vector<5x32xf32>
    %c0_92 = arith.constant 0 : index
    %c0_93 = arith.constant 0 : index
    %c0_94 = arith.constant 0 : index
    %127 = vector.load %arg21[%c0_92, %c0_93, %c0_94] : memref<2x1x32xf32, #tpu.memory_space<vmem>>, vector<1x1x32xf32>
    %128 = vector.shape_cast %127 : vector<1x1x32xf32> to vector<1x32xf32>
    %129 = vector.broadcast %128 : vector<1x32xf32> to vector<5x32xf32>
    %130 = arith.addf %126, %129 : vector<5x32xf32>
    %c1_95 = arith.constant 1 : index
    %c0_96 = arith.constant 0 : index
    %c0_97 = arith.constant 0 : index
    %c0_98 = arith.constant 0 : index
    %131 = vector.load %arg8[%c1_95, %c0_96, %c0_97, %c0_98] : memref<2x4x8x32xf32, #tpu.memory_space<vmem>>, vector<1x4x8x32xf32>
    %132 = vector.shape_cast %131 : vector<1x4x8x32xf32> to vector<4x8x32xf32>
    %c1_99 = arith.constant 1 : index
    %c0_100 = arith.constant 0 : index
    %c0_101 = arith.constant 0 : index
    %c0_102 = arith.constant 0 : index
    %133 = vector.load %arg9[%c1_99, %c0_100, %c0_101, %c0_102] : memref<2x4x1x8xf32, #tpu.memory_space<vmem>>, vector<1x4x1x8xf32>
    %134 = vector.shape_cast %133 : vector<1x4x1x8xf32> to vector<4x1x8xf32>
    %c1_103 = arith.constant 1 : index
    %c0_104 = arith.constant 0 : index
    %c0_105 = arith.constant 0 : index
    %c0_106 = arith.constant 0 : index
    %135 = vector.load %arg10[%c1_103, %c0_104, %c0_105, %c0_106] : memref<2x4x8x32xf32, #tpu.memory_space<vmem>>, vector<1x4x8x32xf32>
    %136 = vector.shape_cast %135 : vector<1x4x8x32xf32> to vector<4x8x32xf32>
    %c1_107 = arith.constant 1 : index
    %c0_108 = arith.constant 0 : index
    %c0_109 = arith.constant 0 : index
    %c0_110 = arith.constant 0 : index
    %137 = vector.load %arg11[%c1_107, %c0_108, %c0_109, %c0_110] : memref<2x4x1x8xf32, #tpu.memory_space<vmem>>, vector<1x4x1x8xf32>
    %138 = vector.shape_cast %137 : vector<1x4x1x8xf32> to vector<4x1x8xf32>
    %c1_111 = arith.constant 1 : index
    %c0_112 = arith.constant 0 : index
    %c0_113 = arith.constant 0 : index
    %c0_114 = arith.constant 0 : index
    %139 = vector.load %arg12[%c1_111, %c0_112, %c0_113, %c0_114] : memref<2x4x8x32xf32, #tpu.memory_space<vmem>>, vector<1x4x8x32xf32>
    %140 = vector.shape_cast %139 : vector<1x4x8x32xf32> to vector<4x8x32xf32>
    %c1_115 = arith.constant 1 : index
    %c0_116 = arith.constant 0 : index
    %c0_117 = arith.constant 0 : index
    %c0_118 = arith.constant 0 : index
    %141 = vector.load %arg13[%c1_115, %c0_116, %c0_117, %c0_118] : memref<2x4x1x8xf32, #tpu.memory_space<vmem>>, vector<1x4x1x8xf32>
    %142 = vector.shape_cast %141 : vector<1x4x1x8xf32> to vector<4x1x8xf32>
    %c1_119 = arith.constant 1 : index
    %c0_120 = arith.constant 0 : index
    %c0_121 = arith.constant 0 : index
    %c0_122 = arith.constant 0 : index
    %143 = vector.load %arg14[%c1_119, %c0_120, %c0_121, %c0_122] : memref<2x4x8x32xf32, #tpu.memory_space<vmem>>, vector<1x4x8x32xf32>
    %144 = vector.shape_cast %143 : vector<1x4x8x32xf32> to vector<4x8x32xf32>
    %c1_123 = arith.constant 1 : index
    %c0_124 = arith.constant 0 : index
    %c0_125 = arith.constant 0 : index
    %145 = vector.load %arg15[%c1_123, %c0_124, %c0_125] : memref<2x1x32xf32, #tpu.memory_space<vmem>>, vector<1x1x32xf32>
    %146 = vector.shape_cast %145 : vector<1x1x32xf32> to vector<1x32xf32>
    %c1_126 = arith.constant 1 : index
    %c0_127 = arith.constant 0 : index
    %c0_128 = arith.constant 0 : index
    %147 = vector.load %arg6[%c1_126, %c0_127, %c0_128] : memref<2x1x32xf32, #tpu.memory_space<vmem>>, vector<1x1x32xf32>
    %148 = vector.shape_cast %147 : vector<1x1x32xf32> to vector<1x32xf32>
    %c1_129 = arith.constant 1 : index
    %c0_130 = arith.constant 0 : index
    %c0_131 = arith.constant 0 : index
    %149 = vector.load %arg7[%c1_129, %c0_130, %c0_131] : memref<2x1x32xf32, #tpu.memory_space<vmem>>, vector<1x1x32xf32>
    %150 = vector.shape_cast %149 : vector<1x1x32xf32> to vector<1x32xf32>
    %cst_132 = arith.constant dense<0.000000e+00> : vector<5xf32>
    %151 = vector.multi_reduction <add>, %130, %cst_132 [1] : vector<5x32xf32> to vector<5xf32>
    %152 = vector.shape_cast %151 : vector<5xf32> to vector<5x1xf32>
    %cst_133 = arith.constant 3.200000e+01 : f32
    %153 = vector.broadcast %cst_133 : f32 to vector<5x1xf32>
    %154 = arith.divf %152, %153 : vector<5x1xf32>
    %155 = vector.broadcast %154 : vector<5x1xf32> to vector<5x32xf32>
    %156 = arith.subf %130, %155 : vector<5x32xf32>
    %157 = arith.mulf %156, %156 : vector<5x32xf32>
    %cst_134 = arith.constant dense<0.000000e+00> : vector<5xf32>
    %158 = vector.multi_reduction <add>, %157, %cst_134 [1] : vector<5x32xf32> to vector<5xf32>
    %159 = vector.shape_cast %158 : vector<5xf32> to vector<5x1xf32>
    %cst_135 = arith.constant 3.200000e+01 : f32
    %160 = vector.broadcast %cst_135 : f32 to vector<5x1xf32>
    %161 = arith.divf %159, %160 : vector<5x1xf32>
    %162 = vector.broadcast %154 : vector<5x1xf32> to vector<5x32xf32>
    %163 = arith.subf %130, %162 : vector<5x32xf32>
    %cst_136 = arith.constant 9.99999974E-6 : f32
    %164 = vector.broadcast %cst_136 : f32 to vector<5x1xf32>
    %165 = arith.addf %161, %164 : vector<5x1xf32>
    %166 = math.rsqrt %165 : vector<5x1xf32>
    %167 = vector.broadcast %166 : vector<5x1xf32> to vector<5x32xf32>
    %168 = arith.mulf %163, %167 : vector<5x32xf32>
    %169 = vector.broadcast %148 : vector<1x32xf32> to vector<5x32xf32>
    %170 = arith.mulf %168, %169 : vector<5x32xf32>
    %171 = vector.broadcast %150 : vector<1x32xf32> to vector<5x32xf32>
    %172 = arith.addf %170, %171 : vector<5x32xf32>
    %173 = vector.shape_cast %172 : vector<5x32xf32> to vector<1x5x32xf32>
    %174 = vector.broadcast %173 : vector<1x5x32xf32> to vector<4x5x32xf32>
    "tpu.trace_start"() <{level = 10 : i32, message = "hse,hde->hsd"}> : () -> ()
    %cst_137 = arith.constant dense<0.000000e+00> : vector<4x5x8xf32>
    %175 = tpu.matmul %174, %132, %cst_137 {dimension_numbers = #tpu.dot_dimension_numbers<[2], [2], [1], [1], [0, 0, 0, 1, 1, 1], [0], [0]>} : vector<4x5x32xf32>, vector<4x8x32xf32>, vector<4x5x8xf32> -> vector<4x5x8xf32>
    "tpu.trace_stop"() : () -> ()
    %176 = vector.broadcast %134 : vector<4x1x8xf32> to vector<4x5x8xf32>
    %177 = arith.addf %175, %176 : vector<4x5x8xf32>
    "tpu.trace_start"() <{level = 10 : i32, message = "hse,hde->hsd"}> : () -> ()
    %cst_138 = arith.constant dense<0.000000e+00> : vector<4x5x8xf32>
    %178 = tpu.matmul %174, %136, %cst_138 {dimension_numbers = #tpu.dot_dimension_numbers<[2], [2], [1], [1], [0, 0, 0, 1, 1, 1], [0], [0]>} : vector<4x5x32xf32>, vector<4x8x32xf32>, vector<4x5x8xf32> -> vector<4x5x8xf32>
    "tpu.trace_stop"() : () -> ()
    %179 = vector.broadcast %138 : vector<4x1x8xf32> to vector<4x5x8xf32>
    %180 = arith.addf %178, %179 : vector<4x5x8xf32>
    "tpu.trace_start"() <{level = 10 : i32, message = "hse,hde->hsd"}> : () -> ()
    %cst_139 = arith.constant dense<0.000000e+00> : vector<4x5x8xf32>
    %181 = tpu.matmul %174, %140, %cst_139 {dimension_numbers = #tpu.dot_dimension_numbers<[2], [2], [1], [1], [0, 0, 0, 1, 1, 1], [0], [0]>} : vector<4x5x32xf32>, vector<4x8x32xf32>, vector<4x5x8xf32> -> vector<4x5x8xf32>
    "tpu.trace_stop"() : () -> ()
    %182 = vector.broadcast %142 : vector<4x1x8xf32> to vector<4x5x8xf32>
    %183 = arith.addf %181, %182 : vector<4x5x8xf32>
    "tpu.trace_start"() <{level = 10 : i32, message = "hsd,htd->hst"}> : () -> ()
    %cst_140 = arith.constant dense<0.000000e+00> : vector<4x5x5xf32>
    %184 = tpu.matmul %177, %180, %cst_140 {dimension_numbers = #tpu.dot_dimension_numbers<[2], [2], [1], [1], [0, 0, 0, 1, 1, 1], [0], [0]>} : vector<4x5x8xf32>, vector<4x5x8xf32>, vector<4x5x5xf32> -> vector<4x5x5xf32>
    "tpu.trace_stop"() : () -> ()
    %cst_141 = arith.constant dense<0xFF800000> : vector<4x5xf32>
    %185 = vector.multi_reduction <maximumf>, %184, %cst_141 [2] : vector<4x5x5xf32> to vector<4x5xf32>
    %186 = vector.shape_cast %185 : vector<4x5xf32> to vector<4x5x1xf32>
    %187 = vector.broadcast %186 : vector<4x5x1xf32> to vector<4x5x5xf32>
    %188 = arith.subf %184, %187 : vector<4x5x5xf32>
    %189 = math.exp %188 : vector<4x5x5xf32>
    %cst_142 = arith.constant dense<0.000000e+00> : vector<4x5xf32>
    %190 = vector.multi_reduction <add>, %189, %cst_142 [2] : vector<4x5x5xf32> to vector<4x5xf32>
    %191 = vector.shape_cast %190 : vector<4x5xf32> to vector<4x5x1xf32>
    %192 = tpu.reciprocal %191 {approx = true} : vector<4x5x1xf32> -> vector<4x5x1xf32>
    %193 = vector.broadcast %192 : vector<4x5x1xf32> to vector<4x5x5xf32>
    %194 = arith.mulf %189, %193 : vector<4x5x5xf32>
    "tpu.trace_start"() <{level = 10 : i32, message = "hst,htd->hsd"}> : () -> ()
    %cst_143 = arith.constant dense<0.000000e+00> : vector<4x5x8xf32>
    %195 = tpu.matmul %194, %183, %cst_143 {dimension_numbers = #tpu.dot_dimension_numbers<[2], [1], [1], [2], [0, 0, 0, 1, 1, 2], [0], [0]>} : vector<4x5x5xf32>, vector<4x5x8xf32>, vector<4x5x8xf32> -> vector<4x5x8xf32>
    "tpu.trace_stop"() : () -> ()
    "tpu.trace_start"() <{level = 10 : i32, message = "hsd,hde->hse"}> : () -> ()
    %cst_144 = arith.constant dense<0.000000e+00> : vector<4x5x32xf32>
    %196 = tpu.matmul %195, %144, %cst_144 {dimension_numbers = #tpu.dot_dimension_numbers<[2], [1], [1], [2], [0, 0, 0, 1, 1, 2], [0], [0]>} : vector<4x5x8xf32>, vector<4x8x32xf32>, vector<4x5x32xf32> -> vector<4x5x32xf32>
    "tpu.trace_stop"() : () -> ()
    %cst_145 = arith.constant dense<0.000000e+00> : vector<5x32xf32>
    %197 = vector.multi_reduction <add>, %196, %cst_145 [0] : vector<4x5x32xf32> to vector<5x32xf32>
    %198 = arith.addf %130, %197 : vector<5x32xf32>
    %199 = vector.broadcast %146 : vector<1x32xf32> to vector<5x32xf32>
    %200 = arith.addf %198, %199 : vector<5x32xf32>
    %c1_146 = arith.constant 1 : index
    %c0_147 = arith.constant 0 : index
    %c0_148 = arith.constant 0 : index
    %201 = vector.load %arg16[%c1_146, %c0_147, %c0_148] : memref<2x1x32xf32, #tpu.memory_space<vmem>>, vector<1x1x32xf32>
    %202 = vector.shape_cast %201 : vector<1x1x32xf32> to vector<1x32xf32>
    %c1_149 = arith.constant 1 : index
    %c0_150 = arith.constant 0 : index
    %c0_151 = arith.constant 0 : index
    %203 = vector.load %arg17[%c1_149, %c0_150, %c0_151] : memref<2x1x32xf32, #tpu.memory_space<vmem>>, vector<1x1x32xf32>
    %204 = vector.shape_cast %203 : vector<1x1x32xf32> to vector<1x32xf32>
    %cst_152 = arith.constant dense<0.000000e+00> : vector<5xf32>
    %205 = vector.multi_reduction <add>, %200, %cst_152 [1] : vector<5x32xf32> to vector<5xf32>
    %206 = vector.shape_cast %205 : vector<5xf32> to vector<5x1xf32>
    %cst_153 = arith.constant 3.200000e+01 : f32
    %207 = vector.broadcast %cst_153 : f32 to vector<5x1xf32>
    %208 = arith.divf %206, %207 : vector<5x1xf32>
    %209 = vector.broadcast %208 : vector<5x1xf32> to vector<5x32xf32>
    %210 = arith.subf %200, %209 : vector<5x32xf32>
    %211 = arith.mulf %210, %210 : vector<5x32xf32>
    %cst_154 = arith.constant dense<0.000000e+00> : vector<5xf32>
    %212 = vector.multi_reduction <add>, %211, %cst_154 [1] : vector<5x32xf32> to vector<5xf32>
    %213 = vector.shape_cast %212 : vector<5xf32> to vector<5x1xf32>
    %cst_155 = arith.constant 3.200000e+01 : f32
    %214 = vector.broadcast %cst_155 : f32 to vector<5x1xf32>
    %215 = arith.divf %213, %214 : vector<5x1xf32>
    %216 = vector.broadcast %208 : vector<5x1xf32> to vector<5x32xf32>
    %217 = arith.subf %200, %216 : vector<5x32xf32>
    %cst_156 = arith.constant 9.99999974E-6 : f32
    %218 = vector.broadcast %cst_156 : f32 to vector<5x1xf32>
    %219 = arith.addf %215, %218 : vector<5x1xf32>
    %220 = math.rsqrt %219 : vector<5x1xf32>
    %221 = vector.broadcast %220 : vector<5x1xf32> to vector<5x32xf32>
    %222 = arith.mulf %217, %221 : vector<5x32xf32>
    %223 = vector.broadcast %202 : vector<1x32xf32> to vector<5x32xf32>
    %224 = arith.mulf %222, %223 : vector<5x32xf32>
    %225 = vector.broadcast %204 : vector<1x32xf32> to vector<5x32xf32>
    %226 = arith.addf %224, %225 : vector<5x32xf32>
    %c1_157 = arith.constant 1 : index
    %c0_158 = arith.constant 0 : index
    %c0_159 = arith.constant 0 : index
    %227 = vector.load %arg18[%c1_157, %c0_158, %c0_159] : memref<2x32x16xf32, #tpu.memory_space<vmem>>, vector<1x32x16xf32>
    %228 = vector.shape_cast %227 : vector<1x32x16xf32> to vector<32x16xf32>
    %cst_160 = arith.constant dense<0.000000e+00> : vector<5x16xf32>
    %229 = tpu.matmul %226, %228, %cst_160 {dimension_numbers = #tpu.dot_dimension_numbers<[1], [0], [0], [1], [0, 0, 1, 1], [], []>} : vector<5x32xf32>, vector<32x16xf32>, vector<5x16xf32> -> vector<5x16xf32>
    %c1_161 = arith.constant 1 : index
    %c0_162 = arith.constant 0 : index
    %c0_163 = arith.constant 0 : index
    %230 = vector.load %arg19[%c1_161, %c0_162, %c0_163] : memref<2x1x16xf32, #tpu.memory_space<vmem>>, vector<1x1x16xf32>
    %231 = vector.shape_cast %230 : vector<1x1x16xf32> to vector<1x16xf32>
    %232 = vector.broadcast %231 : vector<1x16xf32> to vector<5x16xf32>
    %233 = arith.addf %229, %232 : vector<5x16xf32>
    %cst_164 = arith.constant 0.000000e+00 : f32
    %234 = vector.broadcast %cst_164 : f32 to vector<5x16xf32>
    %235 = arith.maximumf %233, %234 : vector<5x16xf32>
    %c1_165 = arith.constant 1 : index
    %c0_166 = arith.constant 0 : index
    %c0_167 = arith.constant 0 : index
    %236 = vector.load %arg20[%c1_165, %c0_166, %c0_167] : memref<2x16x32xf32, #tpu.memory_space<vmem>>, vector<1x16x32xf32>
    %237 = vector.shape_cast %236 : vector<1x16x32xf32> to vector<16x32xf32>
    %cst_168 = arith.constant dense<0.000000e+00> : vector<5x32xf32>
    %238 = tpu.matmul %235, %237, %cst_168 {dimension_numbers = #tpu.dot_dimension_numbers<[1], [0], [0], [1], [0, 0, 1, 1], [], []>} : vector<5x16xf32>, vector<16x32xf32>, vector<5x32xf32> -> vector<5x32xf32>
    %239 = arith.addf %200, %238 : vector<5x32xf32>
    %c1_169 = arith.constant 1 : index
    %c0_170 = arith.constant 0 : index
    %c0_171 = arith.constant 0 : index
    %240 = vector.load %arg21[%c1_169, %c0_170, %c0_171] : memref<2x1x32xf32, #tpu.memory_space<vmem>>, vector<1x1x32xf32>
    %241 = vector.shape_cast %240 : vector<1x1x32xf32> to vector<1x32xf32>
    %242 = vector.broadcast %241 : vector<1x32xf32> to vector<5x32xf32>
    %243 = arith.addf %239, %242 : vector<5x32xf32>
    %c0_172 = arith.constant 0 : index
    %c0_173 = arith.constant 0 : index
    %c0_174 = arith.constant 0 : index
    %244 = vector.load %arg22[%c0_172, %c0_173, %c0_174] : memref<1x5x32xf32, #tpu.memory_space<vmem>>, vector<1x5x32xf32>
    %245 = vector.shape_cast %244 : vector<1x5x32xf32> to vector<5x32xf32>
    %246 = vector.shape_cast %243 : vector<5x32xf32> to vector<1x5x32xf32>
    tpu.vector_store %arg22[%c0_172, %c0_173, %c0_174], %246 {strides = array<i32>} : memref<1x5x32xf32, #tpu.memory_space<vmem>>, vector<1x5x32xf32>,
    return
  }
  func.func @transform_0(%arg0: i32) -> (i32, i32, i32) {
    %c0_i32 = arith.constant 0 : i32
    %c0_i32_0 = arith.constant 0 : i32
    %c0_i32_1 = arith.constant 0 : i32
    return %arg0, %c0_i32, %c0_i32_0 : i32, i32, i32
  }
  func.func @transform_1(%arg0: i32) -> (i32, i32) {
    %c0_i32 = arith.constant 0 : i32
    %c0_i32_0 = arith.constant 0 : i32
    %c0_i32_1 = arith.constant 0 : i32
    return %c0_i32, %c0_i32_0 : i32, i32
  }
  func.func @transform_2(%arg0: i32) -> (i32, i32) {
    %c0_i32 = arith.constant 0 : i32
    %c0_i32_0 = arith.constant 0 : i32
    %c0_i32_1 = arith.constant 0 : i32
    return %c0_i32, %c0_i32_0 : i32, i32
  }
  func.func @transform_3(%arg0: i32) -> (i32, i32) {
    %c0_i32 = arith.constant 0 : i32
    %c0_i32_0 = arith.constant 0 : i32
    %c0_i32_1 = arith.constant 0 : i32
    return %c0_i32, %c0_i32_0 : i32, i32
  }
  func.func @transform_4(%arg0: i32) -> (i32, i32) {
    %c0_i32 = arith.constant 0 : i32
    %c0_i32_0 = arith.constant 0 : i32
    %c0_i32_1 = arith.constant 0 : i32
    return %c0_i32, %c0_i32_0 : i32, i32
  }
  func.func @transform_5(%arg0: i32) -> (i32, i32, i32) {
    %c0_i32 = arith.constant 0 : i32
    %c0_i32_0 = arith.constant 0 : i32
    %c0_i32_1 = arith.constant 0 : i32
    %c0_i32_2 = arith.constant 0 : i32
    return %c0_i32, %c0_i32_0, %c0_i32_1 : i32, i32, i32
  }
  func.func @transform_6(%arg0: i32) -> (i32, i32, i32) {
    %c0_i32 = arith.constant 0 : i32
    %c0_i32_0 = arith.constant 0 : i32
    %c0_i32_1 = arith.constant 0 : i32
    %c0_i32_2 = arith.constant 0 : i32
    return %c0_i32, %c0_i32_0, %c0_i32_1 : i32, i32, i32
  }
  func.func @transform_7(%arg0: i32) -> (i32, i32, i32, i32) {
    %c0_i32 = arith.constant 0 : i32
    %c0_i32_0 = arith.constant 0 : i32
    %c0_i32_1 = arith.constant 0 : i32
    %c0_i32_2 = arith.constant 0 : i32
    %c0_i32_3 = arith.constant 0 : i32
    return %c0_i32, %c0_i32_0, %c0_i32_1, %c0_i32_2 : i32, i32, i32, i32
  }
  func.func @transform_8(%arg0: i32) -> (i32, i32, i32, i32) {
    %c0_i32 = arith.constant 0 : i32
    %c0_i32_0 = arith.constant 0 : i32
    %c0_i32_1 = arith.constant 0 : i32
    %c0_i32_2 = arith.constant 0 : i32
    %c0_i32_3 = arith.constant 0 : i32
    return %c0_i32, %c0_i32_0, %c0_i32_1, %c0_i32_2 : i32, i32, i32, i32
  }
  func.func @transform_9(%arg0: i32) -> (i32, i32, i32, i32) {
    %c0_i32 = arith.constant 0 : i32
    %c0_i32_0 = arith.constant 0 : i32
    %c0_i32_1 = arith.constant 0 : i32
    %c0_i32_2 = arith.constant 0 : i32
    %c0_i32_3 = arith.constant 0 : i32
    return %c0_i32, %c0_i32_0, %c0_i32_1, %c0_i32_2 : i32, i32, i32, i32
  }
  func.func @transform_10(%arg0: i32) -> (i32, i32, i32, i32) {
    %c0_i32 = arith.constant 0 : i32
    %c0_i32_0 = arith.constant 0 : i32
    %c0_i32_1 = arith.constant 0 : i32
    %c0_i32_2 = arith.constant 0 : i32
    %c0_i32_3 = arith.constant 0 : i32
    return %c0_i32, %c0_i32_0, %c0_i32_1, %c0_i32_2 : i32, i32, i32, i32
  }
  func.func @transform_11(%arg0: i32) -> (i32, i32, i32, i32) {
    %c0_i32 = arith.constant 0 : i32
    %c0_i32_0 = arith.constant 0 : i32
    %c0_i32_1 = arith.constant 0 : i32
    %c0_i32_2 = arith.constant 0 : i32
    %c0_i32_3 = arith.constant 0 : i32
    return %c0_i32, %c0_i32_0, %c0_i32_1, %c0_i32_2 : i32, i32, i32, i32
  }
  func.func @transform_12(%arg0: i32) -> (i32, i32, i32, i32) {
    %c0_i32 = arith.constant 0 : i32
    %c0_i32_0 = arith.constant 0 : i32
    %c0_i32_1 = arith.constant 0 : i32
    %c0_i32_2 = arith.constant 0 : i32
    %c0_i32_3 = arith.constant 0 : i32
    return %c0_i32, %c0_i32_0, %c0_i32_1, %c0_i32_2 : i32, i32, i32, i32
  }
  func.func @transform_13(%arg0: i32) -> (i32, i32, i32, i32) {
    %c0_i32 = arith.constant 0 : i32
    %c0_i32_0 = arith.constant 0 : i32
    %c0_i32_1 = arith.constant 0 : i32
    %c0_i32_2 = arith.constant 0 : i32
    %c0_i32_3 = arith.constant 0 : i32
    return %c0_i32, %c0_i32_0, %c0_i32_1, %c0_i32_2 : i32, i32, i32, i32
  }
  func.func @transform_14(%arg0: i32) -> (i32, i32, i32) {
    %c0_i32 = arith.constant 0 : i32
    %c0_i32_0 = arith.constant 0 : i32
    %c0_i32_1 = arith.constant 0 : i32
    %c0_i32_2 = arith.constant 0 : i32
    return %c0_i32, %c0_i32_0, %c0_i32_1 : i32, i32, i32
  }
  func.func @transform_15(%arg0: i32) -> (i32, i32, i32) {
    %c0_i32 = arith.constant 0 : i32
    %c0_i32_0 = arith.constant 0 : i32
    %c0_i32_1 = arith.constant 0 : i32
    %c0_i32_2 = arith.constant 0 : i32
    return %c0_i32, %c0_i32_0, %c0_i32_1 : i32, i32, i32
  }
  func.func @transform_16(%arg0: i32) -> (i32, i32, i32) {
    %c0_i32 = arith.constant 0 : i32
    %c0_i32_0 = arith.constant 0 : i32
    %c0_i32_1 = arith.constant 0 : i32
    %c0_i32_2 = arith.constant 0 : i32
    return %c0_i32, %c0_i32_0, %c0_i32_1 : i32, i32, i32
  }
  func.func @transform_17(%arg0: i32) -> (i32, i32, i32) {
    %c0_i32 = arith.constant 0 : i32
    %c0_i32_0 = arith.constant 0 : i32
    %c0_i32_1 = arith.constant 0 : i32
    %c0_i32_2 = arith.constant 0 : i32
    return %c0_i32, %c0_i32_0, %c0_i32_1 : i32, i32, i32
  }
  func.func @transform_18(%arg0: i32) -> (i32, i32, i32) {
    %c0_i32 = arith.constant 0 : i32
    %c0_i32_0 = arith.constant 0 : i32
    %c0_i32_1 = arith.constant 0 : i32
    %c0_i32_2 = arith.constant 0 : i32
    return %c0_i32, %c0_i32_0, %c0_i32_1 : i32, i32, i32
  }
  func.func @transform_19(%arg0: i32) -> (i32, i32, i32) {
    %c0_i32 = arith.constant 0 : i32
    %c0_i32_0 = arith.constant 0 : i32
    %c0_i32_1 = arith.constant 0 : i32
    %c0_i32_2 = arith.constant 0 : i32
    return %c0_i32, %c0_i32_0, %c0_i32_1 : i32, i32, i32
  }
  func.func @transform_20(%arg0: i32) -> (i32, i32, i32) {
    %c0_i32 = arith.constant 0 : i32
    %c0_i32_0 = arith.constant 0 : i32
    %c0_i32_1 = arith.constant 0 : i32
    %c0_i32_2 = arith.constant 0 : i32
    return %c0_i32, %c0_i32_0, %c0_i32_1 : i32, i32, i32
  }
  func.func @transform_21(%arg0: i32) -> (i32, i32, i32) {
    %c0_i32 = arith.constant 0 : i32
    %c0_i32_0 = arith.constant 0 : i32
    %c0_i32_1 = arith.constant 0 : i32
    return %arg0, %c0_i32, %c0_i32_0 : i32, i32, i32
  }
}

</mosaic_0001>

<bundles_post_ra>
// kernel: vit_forward.1
= control target key start
LH: loop header
LB: loop body
LE: loop exit
PB: predicated region body
PF: predicated region fallthrough
CT: control target
= control target key end

     0   :  { %s7147_s0 = inlined_call_operand.vmem [shape: f32[2,4,768], index: 0, kind: input, shape index: {}]   ;;  %s7148_s1 = inlined_call_operand.vmem [shape: f32[768,32], index: 1, kind: input, shape index: {}]   ;;  %s7149_s2 = inlined_call_operand.vmem [shape: f32[1,32], index: 2, kind: input, shape index: {}]   ;;  %s7150_s3 = inlined_call_operand.vmem [shape: f32[1,32], index: 3, kind: input, shape index: {}]   ;;  %s7151_s4 = inlined_call_operand.vmem [shape: f32[4,32], index: 4, kind: input, shape index: {}]   ;;  %s7152_s5 = inlined_call_operand.vmem [shape: f32[2,1,32], index: 5, kind: input, shape index: {}]   ;;  %s7153_s6 = inlined_call_operand.vmem [shape: f32[2,1,32], index: 6, kind: input, shape index: {}]   ;;  %s7154_s7 = inlined_call_operand.vmem [shape: f32[2,4,8,32], index: 7, kind: input, shape index: {}]   ;;  %s7155_s8 = inlined_call_operand.vmem [shape: f32[2,4,1,8], index: 8, kind: input, shape index: {}]   ;;  %s7156_s9 = inlined_call_operand.vmem [shape: f32[2,4,8,32], index: 9, kind: input, shape index: {}]   ;;  %s7157_s10 = inlined_call_operand.vmem [shape: f32[2,4,1,8], index: 10, kind: input, shape index: {}]   ;;  %s7158_s11 = inlined_call_operand.vmem [shape: f32[2,4,8,32], index: 11, kind: input, shape index: {}]   ;;  %s7159_s12 = inlined_call_operand.vmem [shape: f32[2,4,1,8], index: 12, kind: input, shape index: {}]   ;;  %s7160_s13 = inlined_call_operand.vmem [shape: f32[2,4,8,32], index: 13, kind: input, shape index: {}]   ;;  %s7161_s14 = inlined_call_operand.vmem [shape: f32[2,1,32], index: 14, kind: input, shape index: {}]   ;;  %s7162_s15 = inlined_call_operand.vmem [shape: f32[2,1,32], index: 15, kind: input, shape index: {}]   ;;  %s7163_s16 = inlined_call_operand.vmem [shape: f32[2,1,32], index: 16, kind: input, shape index: {}]   ;;  %s7164_s17 = inlined_call_operand.vmem [shape: f32[2,32,16], index: 17, kind: input, shape index: {}]   ;;  %s7165_s18 = inlined_call_operand.vmem [shape: f32[2,1,16], index: 18, kind: input, shape index: {}]   ;;  %s7166_s19 = inlined_call_operand.vmem [shape: f32[2,16,32], index: 19, kind: input, shape index: {}]   ;;  %s7167_s20 = inlined_call_operand.vmem [shape: f32[2,1,32], index: 20, kind: input, shape index: {}]   ;;  %s7168_s21 = inlined_call_operand.vmem [shape: f32[2,5,32], index: 21, kind: output, shape index: {}]  }
   0x1   :  { %7172 = sst [smem:[#allocation3_spill]] %s7147_s0 }
   0x2   :  { %7173 = sst [smem:[#allocation4_spill]] %s7148_s1 }
   0x3   :  { %7174 = sst [smem:[#allocation5_spill]] %s7149_s2  ;;  %s6246_s2 = smov 0  }
   0x4   :  { %7175 = sst [smem:[#allocation6_spill]] %s7150_s3 }
   0x5   :  { %7176 = sst [smem:[#allocation7_spill]] %s7151_s4 }
   0x6   :  { %7177 = sst [smem:[#allocation8_spill]] %s7152_s5 }
   0x7 LB: > { %7178 = sst [smem:[#allocation2_spill]] %s6132_s2  ;;  %s5398_s25 = sadd.s32 4294967295, %s6132_s2   ;;  %s6132_s2 = sphi %s6246_s2, %s31_s2  }
   0x8   : > { %p5402_p0 = scmp.ge.s32.totalorder %s6132_s2, 1  ;;  %p587_p1 = scmp.lt.s32.totalorder %s6132_s2, 3 }
   0xa   : > { %p588_p2 = pnand %p5402_p0, %p587_p1 }
   0xb   : > { %s7179_s3 = sld [smem:[#allocation4_spill]] (!%p588_p2)  ;;  %p6325_p3 = scmp.lt.s32.totalorder (!%p588_p2), %s5398_s25, 1 }
   0xc   : > { %591 = sbr.rel (%p588_p2) target bundleno = 4549 (0x11c5), region = 104  ;;  %s7181_s0 = sld [smem:[#allocation3_spill]] (!%p588_p2) }
   0xd   : > { %s7182_s23 = sld [smem:[#allocation6_spill]] (!%p588_p2) }
   0xe   : > { %s7183_s24 = sld [smem:[#allocation5_spill]] (!%p588_p2) }
  0x11   : > { %v689_v0 = vld [vmem:[%s7179_s3 + $0xf8] sm:$0xff]  ;;  %v688_v2 = vld [vmem:[%s7179_s3 + $0xf0] sm:$0xff]  ;;  %v687_v6 = vld [vmem:[%s7179_s3 + $0xe8] sm:$0xff]  ;;  %s7188_s25 = smov (!%p6325_p3, %s5398_s25), 1  ;;  %vm981_vm0 = vcmask 253952   ;;  %vm985_vm1 = vcmask 257024  }
  0x12   : > { %v673_v1 = vld [vmem:[%s7179_s3 + $0x78] sm:$0xff]  ;;  %5579 = vmatprep.subr.mxu0 %v689_v0  ;;  %v672_v4 = vld [vmem:[%s7179_s3 + $0x70] sm:$0xff]  ;;  %v671_v8 = vld [vmem:[%s7179_s3 + $0x68] sm:$0xff]  ;;  %s6072_s22 = smul.u32 24, %s7188_s25  ;;  %s5404_s28 = sshll.u32 %s7188_s25, 3  ;;  %vm1019_vm2 = vcmask 258048  }
  0x13   : > { %v721_v3 = vld [vmem:[%s7179_s3 + $0x1f8] sm:$0xff]  ;;  %5580 = vmatpush3.msra.mxu0 %v673_v1  ;;  %v720_v7 = vld [vmem:[%s7179_s3 + $0x1f0] sm:$0xff]  ;;  %v719_v10 = vld [vmem:[%s7179_s3 + $0x1e8] sm:$0xff]  ;;  %s6572_s4 = scalar_lea.vmem %s7168_s21, %s5404_s28  ;;  %vm1072_vm3 = vcmask 261120   ;;  %vm6135_vm4 = vmmov 0   ;;  %vm2000_vm5 = vcmask 64512  }
  0x14   : > { %v705_v5 = vld [vmem:[%s7179_s3 + $0x178] sm:$0xff]  ;;  %5614 = vmatprep.subr.mxu1 %v721_v3  ;;  %5581 = vmatprep.subr.mxu0 %v688_v2  ;;  %v704_v9 = vld [vmem:[%s7179_s3 + $0x170] sm:$0xff]  ;;  %v686_v11 = vld [vmem:[%s7179_s3 + $0xe0] sm:$0xff]  ;;  %s6411_s2 = scalar_lea.vmem %s7181_s0, %s6072_s22  ;;  %s7184_s22 = sld [smem:[#allocation7_spill]]  ;;  %vm2354_vm6 = vcmask 1044480   ;;  %vm2305_vm7 = vcmask 36864  }
  0x15   : > { %5615 = vmatpush3.msra.mxu1 %v705_v5  ;;  %5582 = vmatpush3.msra.mxu0 %v672_v4  ;;  %v703_v12 = vld [vmem:[%s7179_s3 + $0x168] sm:$0xff]  ;;  %v670_v13 = vld [vmem:[%s7179_s3 + $0x60] sm:$0xff]  ;;  %v685_v15 = vld [vmem:[%s7179_s3 + $0xd8] sm:$0xff]  ;;  %vm2350_vm8 = vcmask 39936   ;;  %vm3079_vm9 = vcmask 130048  }
  0x16   : > { %5616 = vmatprep.subr.mxu1 %v720_v7  ;;  %5583 = vmatprep.subr.mxu0 %v687_v6  ;;  %v718_v14 = vld [vmem:[%s7179_s3 + $0x1e0] sm:$0xff]  ;;  %v669_v17 = vld [vmem:[%s7179_s3 + $0x58] sm:$0xff]  ;;  %v684_v19 = vld [vmem:[%s7179_s3 + $0xd0] sm:$0xff] }
  0x17   : > { %5617 = vmatpush3.msra.mxu1 %v704_v9  ;;  %5584 = vmatpush3.msra.mxu0 %v671_v8  ;;  %v702_v16 = vld [vmem:[%s7179_s3 + $0x160] sm:$0xff]  ;;  %v717_v18 = vld [vmem:[%s7179_s3 + $0x1d8] sm:$0xff]  ;;  %v668_v21 = vld [vmem:[%s7179_s3 + $0x50] sm:$0xff] }
  0x18   : > { %5618 = vmatprep.subr.mxu1 %v719_v10  ;;  %5585 = vmatprep.subr.mxu0 %v686_v11  ;;  %v701_v20 = vld [vmem:[%s7179_s3 + $0x158] sm:$0xff]  ;;  %v716_v22 = vld [vmem:[%s7179_s3 + $0x1d0] sm:$0xff]  ;;  %v683_v23 = vld [vmem:[%s7179_s3 + $0xc8] sm:$0xff] }
  0x19   : > { %5619 = vmatpush3.msra.mxu1 %v703_v12  ;;  %5586 = vmatpush3.msra.mxu0 %v670_v13  ;;  %v700_v24 = vld [vmem:[%s7179_s3 + $0x150] sm:$0xff]  ;;  %v667_v25 = vld [vmem:[%s7179_s3 + $0x48] sm:$0xff]  ;;  %v682_v27 = vld [vmem:[%s7179_s3 + $0xc0] sm:$0xff] }
  0x1a   : > { %5620 = vmatprep.subr.mxu1 %v718_v14  ;;  %5587 = vmatprep.subr.mxu0 %v685_v15  ;;  %v715_v26 = vld [vmem:[%s7179_s3 + $0x1c8] sm:$0xff]  ;;  %v666_v29 = vld [vmem:[%s7179_s3 + $0x40] sm:$0xff]  ;;  %v681_v31 = vld [vmem:[%s7179_s3 + $0xb8] sm:$0xff] }
  0x1b   : > { %5621 = vmatpush3.msra.mxu1 %v702_v16  ;;  %5588 = vmatpush3.msra.mxu0 %v669_v17  ;;  %v699_v28 = vld [vmem:[%s7179_s3 + $0x148] sm:$0xff]  ;;  %v714_v30 = vld [vmem:[%s7179_s3 + $0x1c0] sm:$0xff]  ;;  %v665_v33 = vld [vmem:[%s7179_s3 + $0x38] sm:$0xff] }
  0x1c   : > { %5622 = vmatprep.subr.mxu1 %v717_v18  ;;  %5589 = vmatprep.subr.mxu0 %v684_v19  ;;  %v698_v32 = vld [vmem:[%s7179_s3 + $0x140] sm:$0xff]  ;;  %v713_v34 = vld [vmem:[%s7179_s3 + $0x1b8] sm:$0xff]  ;;  %v680_v35 = vld [vmem:[%s7179_s3 + $0xb0] sm:$0xff] }
  0x1d   : > { %5623 = vmatpush3.msra.mxu1 %v701_v20  ;;  %5590 = vmatpush3.msra.mxu0 %v668_v21  ;;  %v697_v36 = vld [vmem:[%s7179_s3 + $0x138] sm:$0xff]  ;;  %v664_v37 = vld [vmem:[%s7179_s3 + $0x30] sm:$0xff]  ;;  %v679_v39 = vld [vmem:[%s7179_s3 + $0xa8] sm:$0xff] }
  0x1e   : > { %5624 = vmatprep.subr.mxu1 %v716_v22  ;;  %5591 = vmatprep.subr.mxu0 %v683_v23  ;;  %v712_v38 = vld [vmem:[%s7179_s3 + $0x1b0] sm:$0xff]  ;;  %v663_v41 = vld [vmem:[%s7179_s3 + $0x28] sm:$0xff]  ;;  %v678_v43 = vld [vmem:[%s7179_s3 + $0xa0] sm:$0xff] }
  0x1f   : > { %5625 = vmatpush3.msra.mxu1 %v700_v24  ;;  %5592 = vmatpush3.msra.mxu0 %v667_v25  ;;  %v696_v40 = vld [vmem:[%s7179_s3 + $0x130] sm:$0xff]  ;;  %v711_v42 = vld [vmem:[%s7179_s3 + $0x1a8] sm:$0xff]  ;;  %v662_v45 = vld [vmem:[%s7179_s3 + $0x20] sm:$0xff] }
  0x20   : > { %5626 = vmatprep.subr.mxu1 %v715_v26  ;;  %5593 = vmatprep.subr.mxu0 %v682_v27  ;;  %v695_v44 = vld [vmem:[%s7179_s3 + $0x128] sm:$0xff]  ;;  %v710_v46 = vld [vmem:[%s7179_s3 + $0x1a0] sm:$0xff]  ;;  %v677_v47 = vld [vmem:[%s7179_s3 + $0x98] sm:$0xff] }
  0x21   : > { %5627 = vmatpush3.msra.mxu1 %v699_v28  ;;  %5594 = vmatpush3.msra.mxu0 %v666_v29  ;;  %v694_v48 = vld [vmem:[%s7179_s3 + $0x120] sm:$0xff]  ;;  %v661_v49 = vld [vmem:[%s7179_s3 + $0x18] sm:$0xff]  ;;  %v676_v51 = vld [vmem:[%s7179_s3 + $0x90] sm:$0xff] }
  0x22   : > { %5628 = vmatprep.subr.mxu1 %v714_v30  ;;  %5595 = vmatprep.subr.mxu0 %v681_v31  ;;  %v709_v50 = vld [vmem:[%s7179_s3 + $0x198] sm:$0xff]  ;;  %v655_v53 = vld [vmem:[%s6411_s2] sm:$0xff]  ;;  %v660_v54 = vld [vmem:[%s7179_s3 + $0x10] sm:$0xff] }
  0x23   : > { %5629 = vmatpush3.msra.mxu1 %v698_v32  ;;  %5596 = vmatpush3.msra.mxu0 %v665_v33  ;;  %v693_v52 = vld [vmem:[%s7179_s3 + $0x118] sm:$0xff]  ;;  %v708_v55 = vld [vmem:[%s7179_s3 + $0x190] sm:$0xff]  ;;  %v675_v56 = vld [vmem:[%s7179_s3 + $0x88] sm:$0xff]  ;;  %v764_v60 = vcombine.high %v655_v53, %v655_v53 }
  0x24   : > { %5630 = vmatprep.subr.mxu1 %v713_v34  ;;  %5597 = vmatprep.subr.mxu0 %v680_v35  ;;  %v692_v57 = vld [vmem:[%s7179_s3 + $0x110] sm:$0xff]  ;;  %v659_v58 = vld [vmem:[%s7179_s3 + $0x8] sm:$0xff]  ;;  %v674_v61 = vld [vmem:[%s7179_s3 + $0x80] sm:$0xff] }
  0x25   : > { %5631 = vmatpush3.msra.mxu1 %v697_v36  ;;  %5598 = vmatpush3.msra.mxu0 %v664_v37  ;;  %v707_v59 = vld [vmem:[%s7179_s3 + $0x188] sm:$0xff]  ;;  %v658_v63 = vld [vmem:[%s7179_s3] sm:$0xff]  ;;  %v753_v2 = vld [vmem:[%s7179_s3 + $0x2f8] sm:$0xff] }
  0x26   : > { %5632 = vmatprep.subr.mxu1 %v712_v38  ;;  %5599 = vmatprep.subr.mxu0 %v679_v39  ;;  %v656_v62 = vld [vmem:[%s6411_s2 + $0x8] sm:$0xff]  ;;  %v706_v1 = vld [vmem:[%s7179_s3 + $0x180] sm:$0xff]  ;;  %v737_v5 = vld [vmem:[%s7179_s3 + $0x278] sm:$0xff] }
  0x27   : > { %5633 = vmatpush3.msra.mxu1 %v696_v40  ;;  %5600 = vmatpush3.msra.mxu0 %v663_v41  ;;  %v691_v0 = vld [vmem:[%s7179_s3 + $0x108] sm:$0xff]  ;;  %v690_v3 = vld [vmem:[%s7179_s3 + $0x100] sm:$0xff]  ;;  %v765_v4 = vcombine.high %v656_v62, %v656_v62  ;;  %v6473_v6 = vld [vmem:[%s6411_s2 + $0x10] sm:$0xff] }
  0x28   : > { %5634 = vmatprep.subr.mxu1 %v711_v42  ;;  %5601 = vmatprep.subr.mxu0 %v678_v43  ;;  %v752_v7 = vld [vmem:[%s7179_s3 + $0x2f0] sm:$0xff]  ;;  %v766_v8 = vcombine.high %v6473_v6, %v6473_v6  ;;  %v751_v10 = vld [vmem:[%s7179_s3 + $0x2e8] sm:$0xff]  ;;  %v750_v12 = vld [vmem:[%s7179_s3 + $0x2e0] sm:$0xff] }
  0x29   : > { %5635 = vmatpush3.msra.mxu1 %v695_v44  ;;  %5602 = vmatpush3.msra.mxu0 %v662_v45  ;;  %v736_v9 = vld [vmem:[%s7179_s3 + $0x270] sm:$0xff]  ;;  %v735_v11 = vld [vmem:[%s7179_s3 + $0x268] sm:$0xff]  ;;  %v734_v13 = vld [vmem:[%s7179_s3 + $0x260] sm:$0xff] }
  0x2a   : > { %5636 = vmatprep.subr.mxu1 %v710_v46  ;;  %5603 = vmatprep.subr.mxu0 %v677_v47  ;;  %v749_v14 = vld [vmem:[%s7179_s3 + $0x2d8] sm:$0xff]  ;;  %v748_v16 = vld [vmem:[%s7179_s3 + $0x2d0] sm:$0xff]  ;;  %v747_v18 = vld [vmem:[%s7179_s3 + $0x2c8] sm:$0xff] }
  0x2b   : > { %5637 = vmatpush3.msra.mxu1 %v694_v48  ;;  %5604 = vmatpush3.msra.mxu0 %v661_v49  ;;  %v733_v15 = vld [vmem:[%s7179_s3 + $0x258] sm:$0xff]  ;;  %v732_v17 = vld [vmem:[%s7179_s3 + $0x250] sm:$0xff]  ;;  %v731_v19 = vld [vmem:[%s7179_s3 + $0x248] sm:$0xff] }
  0x2c   : > { %5638 = vmatprep.subr.mxu1 %v709_v50  ;;  %5605 = vmatprep.subr.mxu0 %v676_v51  ;;  %v746_v20 = vld [vmem:[%s7179_s3 + $0x2c0] sm:$0xff]  ;;  %v745_v22 = vld [vmem:[%s7179_s3 + $0x2b8] sm:$0xff]  ;;  %v744_v24 = vld [vmem:[%s7179_s3 + $0x2b0] sm:$0xff] }
  0x2d   : > { %5639 = vmatpush3.msra.mxu1 %v693_v52  ;;  %5606 = vmatpush3.msra.mxu0 %v660_v54  ;;  %v730_v21 = vld [vmem:[%s7179_s3 + $0x240] sm:$0xff]  ;;  %v729_v23 = vld [vmem:[%s7179_s3 + $0x238] sm:$0xff]  ;;  %v728_v25 = vld [vmem:[%s7179_s3 + $0x230] sm:$0xff] }
  0x2e   : > { %5640 = vmatprep.subr.mxu1 %v708_v55  ;;  %5607 = vmatprep.subr.mxu0 %v675_v56  ;;  %v743_v26 = vld [vmem:[%s7179_s3 + $0x2a8] sm:$0xff]  ;;  %v742_v28 = vld [vmem:[%s7179_s3 + $0x2a0] sm:$0xff]  ;;  %v741_v30 = vld [vmem:[%s7179_s3 + $0x298] sm:$0xff] }
  0x2f   : > { %5641 = vmatpush3.msra.mxu1 %v692_v57  ;;  %5608 = vmatpush3.msra.mxu0 %v659_v58  ;;  %v727_v27 = vld [vmem:[%s7179_s3 + $0x228] sm:$0xff]  ;;  %v726_v29 = vld [vmem:[%s7179_s3 + $0x220] sm:$0xff]  ;;  %v725_v31 = vld [vmem:[%s7179_s3 + $0x218] sm:$0xff] }
  0x30   : > { %5642 = vmatprep.subr.mxu1 %v707_v59  ;;  %5609 = vmatprep.subr.mxu0 %v674_v61  ;;  %v740_v32 = vld [vmem:[%s7179_s3 + $0x290] sm:$0xff]  ;;  %v739_v34 = vld [vmem:[%s7179_s3 + $0x288] sm:$0xff]  ;;  %v738_v36 = vld [vmem:[%s7179_s3 + $0x280] sm:$0xff]  ;;  %v6134_v61 = vmov 0.0  }
  0x31   : > { %834 = vmatprep.mubr.f32.mxu0 %v764_v60  ;;  %5610 = vmatpush3.msra.mxu0 %v658_v63  ;;  %v724_v33 = vld [vmem:[%s7179_s3 + $0x210] sm:$0xff]  ;;  %v723_v35 = vld [vmem:[%s7179_s3 + $0x208] sm:$0xff]  ;;  %v722_v37 = vld [vmem:[%s7179_s3 + $0x200] sm:$0xff] }
  0x32   : > { %5643 = vmatpush3.msra.mxu1 %v691_v0  ;;  %835 = vmatmul.mubr.f32.vlgmr.msra.gmra.mxu0 %v655_v53  ;;  %v980_v38 = vld [vmem:[%s7182_s23] sm:$0x1]  ;;  %s7185_s23 = sld [smem:[#allocation8_spill]] }
  0x33   : > { %5644 = vmatprep.subr.mxu1 %v706_v1  ;;  %5649 = vmatprep.subr.mxu0 %v753_v2  ;;  %982 = vst.msk [vmem:[%s6572_s4] sm:$0x1] %vm981_vm0, %v980_v38  ;;  %v5405_v43 = vld [vmem:[%s7183_s24] ss:$0 sm:$0xff] }
  0x34   : > { %5645 = vmatpush3.msra.mxu1 %v690_v3  ;;  %904 = vmatprep.mubr.f32.mxu1 %v765_v4  ;;  %v983_v51 = vld [vmem:[%s7184_s22] sm:$0xf] }
  0x35   : > { %5650 = vmatpush3.msra.mxu0 %v737_v5  ;;  %905 = vmatmul.mubr.f32.vlgmr.msra.gmra.mxu1 %v656_v62  ;;  %v988_v62 = vld [vmem:[%s7154_s7] sm:$0xff] }
  0x36   : > { %5651 = vmatprep.subr.mxu0 %v752_v7  ;;  %974 = vmatprep.mubr.f32.mxu0 %v766_v8  ;;  %v1004_v63 = vld [vmem:[%s7158_s11] sm:$0xff] }
  0x37   : > { %5652 = vmatpush3.msra.mxu0 %v736_v9  ;;  %5796 = vmatprep.subr.mxu1 %v6134_v61  ;;  %v989_v9 = vld [vmem:[%s7154_s7 + $0x8] sm:$0xff] }
  0x38   : > { %5653 = vmatprep.subr.mxu0 %v751_v10  ;;  %5797 = vmatpush3.xpose.msk.msra.mxu1 %vm1072_vm3, %v988_v62  ;;  %v5406_v4 = vld [vmem:[%s7185_s23] ss:$0 sm:$0xff]  ;;  %v1006_v10 = vld [vmem:[%s7158_s11 + $0x10] sm:$0xff] }
  0x39   : > { %5654 = vmatpush3.msra.mxu0 %v735_v11  ;;  %5801 = vmatprep.subr.mxu1 %v6134_v61  ;;  %v990_v11 = vld [vmem:[%s7154_s7 + $0x10] sm:$0xff] }
  0x3a   : > { %5655 = vmatprep.subr.mxu0 %v750_v12  ;;  %5798 = vmatprep.mubr.msk.f32.mxu1 %vm6135_vm4, %v6134_v61  ;;  %v991_v12 = vld [vmem:[%s7154_s7 + $0x18] sm:$0xff] }
  0x3b   : > { %5656 = vmatpush3.msra.mxu0 %v734_v13  ;;  %v996_v13 = vld [vmem:[%s7156_s9] sm:$0xff] }
  0x3c   : > { %5657 = vmatprep.subr.mxu0 %v749_v14  ;;  %v997_v14 = vld [vmem:[%s7156_s9 + $0x8] sm:$0xff] }
  0x3d   : > { %5658 = vmatpush3.msra.mxu0 %v733_v15  ;;  %v998_v15 = vld [vmem:[%s7156_s9 + $0x10] sm:$0xff] }
  0x3e   : > { %5659 = vmatprep.subr.mxu0 %v748_v16  ;;  %v999_v16 = vld [vmem:[%s7156_s9 + $0x18] sm:$0xff] }
  0x3f   : > { %5660 = vmatpush3.msra.mxu0 %v732_v17  ;;  %v1005_v17 = vld [vmem:[%s7158_s11 + $0x8] sm:$0xff] }
  0x40   : > { %5661 = vmatprep.subr.mxu0 %v747_v18  ;;  %v1007_v18 = vld [vmem:[%s7158_s11 + $0x18] sm:$0xff] }
  0x41   : > { %5662 = vmatpush3.msra.mxu0 %v731_v19 }
  0x42   : > { %5663 = vmatprep.subr.mxu0 %v746_v20 }
  0x43   : > { %5664 = vmatpush3.msra.mxu0 %v730_v21 }
  0x44   : > { %5665 = vmatprep.subr.mxu0 %v745_v22 }
  0x45   : > { %5666 = vmatpush3.msra.mxu0 %v729_v23 }
  0x46   : > { %5667 = vmatprep.subr.mxu0 %v744_v24 }
  0x47   : > { %5668 = vmatpush3.msra.mxu0 %v728_v25 }
  0x48   : > { %5669 = vmatprep.subr.mxu0 %v743_v26 }
  0x49   : > { %5670 = vmatpush3.msra.mxu0 %v727_v27 }
  0x4a   : > { %5671 = vmatprep.subr.mxu0 %v742_v28 }
  0x4b   : > { %5672 = vmatpush3.msra.mxu0 %v726_v29 }
  0x4c   : > { %5673 = vmatprep.subr.mxu0 %v741_v30 }
  0x4d   : > { %5674 = vmatpush3.msra.mxu0 %v725_v31  ;;  %v5420_v31 = vld [vmem:[%s7157_s10] ss:$0 sm:$0xff] }
  0x4e   : > { %5675 = vmatprep.subr.mxu0 %v740_v32 }
  0x4f   : > { %5676 = vmatpush3.msra.mxu0 %v724_v33  ;;  %v5408_v33 = vld [vmem:[%s7155_s8] ss:$0 sm:$0xff] }
  0x50   : > { %5677 = vmatprep.subr.mxu0 %v739_v34 }
  0x51   : > { %5678 = vmatpush3.msra.mxu0 %v723_v35 }
  0x52   : > { %5679 = vmatprep.subr.mxu0 %v738_v36  ;;  %v5421_v36 = vld [vmem:[%s7157_s10 + $0x1] ss:$0 sm:$0xff] }
  0x53   : > { %5680 = vmatpush3.msra.mxu0 %v722_v37 }
  0x54   : > { %975 = vmatmul.mubr.f32.vlgmr.msra.gmra.mxu0 %v6473_v6  ;;  %5836 = vmatprep.subr.mxu0 %v6134_v61  ;;  %v5407_v6 = vld [vmem:[%s7153_s6] ss:$0 sm:$0xff] }
  0x55   : > { %5837 = vmatpush3.xpose.msk.msra.mxu0 %vm1072_vm3, %v1004_v63  ;;  %5838 = vmatprep.mubr.msk.f32.mxu0 %vm6135_vm4, %v6134_v61 }
  0x56   : > { %5846 = vmatprep.subr.mxu0 %v6134_v61 }
  0xf2   : > { %v5611_v39 = vpop.f32.mrf.mxu0 }
  0xf4   : > { %v5612_v40 = vpop.f32.mrf.mxu0 }
  0xf5   : > { %v5646_v41 = vpop.f32.mrf.mxu1  ;;  %v5613_v42 = vadd.f32 %v5612_v40, %v5611_v39  ;;  %v5409_v39 = vld [vmem:[%s7155_s8 + $0x1] ss:$0 sm:$0xff] }
  0xf7   : > { %v5647_v44 = vpop.f32.mrf.mxu1  ;;  %v837_v45 = vadd.f32 %v5613_v42, %v5405_v43  ;;  %v5422_v42 = vld [vmem:[%s7157_s10 + $0x2] ss:$0 sm:$0xff] }
  0xf8   : > { %v5648_v46 = vadd.f32 %v5647_v44, %v5646_v41 }
  0xfa   : > { %v907_v49 = vadd.f32 %v5648_v46, %v837_v45  ;;  %v5410_v45 = vld [vmem:[%s7155_s8 + $0x2] ss:$0 sm:$0xff] }
 0x114   : > { %v5681_v47 = vpop.f32.mrf.mxu0 }
 0x116   : > { %v5682_v48 = vpop.f32.mrf.mxu0 }
 0x117   : > { %v5683_v50 = vadd.f32 %v5682_v48, %v5681_v47  ;;  %v5432_v47 = vld [vmem:[%s7159_s12] ss:$0 sm:$0xff] }
 0x119   : > { %v977_v52 = vadd.f32 %v5683_v50, %v907_v49  ;;  %v5423_v49 = vld [vmem:[%s7157_s10 + $0x3] ss:$0 sm:$0xff] }
 0x11b   : > { %v984_v53 = vadd.f32 %v983_v51, %v977_v52 }
 0x11d   : > { %986 = vst.msk [vmem:[%s6572_s4 + $0x1] sm:$0xf] %vm985_vm1, %v984_v53  ;;  %v5411_v53 = vld [vmem:[%s7155_s8 + $0x3] ss:$0 sm:$0xff] }
 0x124   : > { %v6586_v54 = vld [vmem:[%s6572_s4] sm:$0x1f] }
 0x125   : > { %v1020_v55 = vsel %vm1019_vm2, %v6586_v54, 0.0 }
 0x126   : > { %1021 = vadd.xlane.f32.xlu0 %v1020_v55 }
 0x1af   : > { %v1022_v56 = vpop.xlane.xlu0 %1021 }
 0x1b0   : > { %v1024_v57 = vmul.f32 0.03125, %v1022_v56 }
 0x1b2   : > { %v1025_v58 = vsub.f32 %v6586_v54, %v1024_v57  ;;  %v5433_v57 = vld [vmem:[%s7159_s12 + $0x1] ss:$0 sm:$0xff] }
 0x1b4   : > { %v1026_v59 = vmul.f32 %v1025_v58, %v1025_v58 }
 0x1b6   : > { %v1027_v60 = vsel %vm1019_vm2, %v1026_v59, 0.0 }
 0x1b7   : > { %1028 = vadd.xlane.f32.xlu0 %v1027_v60 }
 0x240   : > { %v1029_v0 = vpop.xlane.xlu0 %1028 }
 0x241   : > { %v1030_v1 = vmul.f32 0.03125, %v1029_v0 }
 0x243   : > { %v1031_v2 = vadd.f32 1e-05, %v1030_v1 }
 0x245   : > { %6086 = vrsqrt.f32 %v1031_v2 }
 0x252   : > { %v6087_v3 = vpop.eup %6086 }
 0x253   : > { %v1033_v5 = vmul.f32 %v6087_v3, %v1025_v58 }
 0x255   : > { %v1040_v7 = vmul.f32 %v5406_v4, %v1033_v5 }
 0x257   : > { %v1047_v8 = vadd.f32 %v5407_v6, %v1040_v7 }
 0x259   : > { %5799 = vmatmul.mubr.msk.f32.vlgmr.msra.gmra.mxu1 %vm1072_vm3, %v1047_v8  ;;  %5839 = vmatmul.mubr.msk.f32.vlgmr.msra.gmra.mxu0 %vm1072_vm3, %v1047_v8 }
 0x25a   : > { %5802 = vmatpush3.xpose.msk.msra.mxu1 %vm1072_vm3, %v989_v9  ;;  %5847 = vmatpush3.xpose.msk.msra.mxu0 %vm1072_vm3, %v1006_v10 }
 0x25b   : > { %5803 = vmatprep.mubr.msk.f32.mxu1 %vm6135_vm4, %v6134_v61  ;;  %5848 = vmatprep.mubr.msk.f32.mxu0 %vm6135_vm4, %v6134_v61 }
 0x25c   : > { %5806 = vmatprep.subr.mxu1 %v6134_v61  ;;  %5856 = vmatprep.subr.mxu0 %v6134_v61 }
 0x25d   : > { %5804 = vmatmul.mubr.msk.f32.vlgmr.msra.gmra.mxu1 %vm1072_vm3, %v1047_v8  ;;  %5849 = vmatmul.mubr.msk.f32.vlgmr.msra.gmra.mxu0 %vm1072_vm3, %v1047_v8 }
 0x25e   : > { %5807 = vmatpush3.xpose.msk.msra.mxu1 %vm1072_vm3, %v990_v11  ;;  %5808 = vmatprep.mubr.msk.f32.mxu1 %vm6135_vm4, %v6134_v61 }
 0x25f   : > { %5811 = vmatprep.subr.mxu1 %v6134_v61  ;;  %5858 = vmatprep.mubr.msk.f32.mxu0 %vm6135_vm4, %v6134_v61 }
 0x261   : > { %5809 = vmatmul.mubr.msk.f32.vlgmr.msra.gmra.mxu1 %vm1072_vm3, %v1047_v8 }
 0x262   : > { %5812 = vmatpush3.xpose.msk.msra.mxu1 %vm1072_vm3, %v991_v12  ;;  %5813 = vmatprep.mubr.msk.f32.mxu1 %vm6135_vm4, %v6134_v61 }
 0x263   : > { %5816 = vmatprep.subr.mxu1 %v6134_v61 }
 0x265   : > { %5814 = vmatmul.mubr.msk.f32.vlgmr.msra.gmra.mxu1 %vm1072_vm3, %v1047_v8 }
 0x266   : > { %5817 = vmatpush3.xpose.msk.msra.mxu1 %vm1072_vm3, %v996_v13  ;;  %5818 = vmatprep.mubr.msk.f32.mxu1 %vm6135_vm4, %v6134_v61 }
 0x267   : > { %5821 = vmatprep.subr.mxu1 %v6134_v61 }
 0x269   : > { %5819 = vmatmul.mubr.msk.f32.vlgmr.msra.gmra.mxu1 %vm1072_vm3, %v1047_v8 }
 0x26a   : > { %5822 = vmatpush3.xpose.msk.msra.mxu1 %vm1072_vm3, %v997_v14  ;;  %5823 = vmatprep.mubr.msk.f32.mxu1 %vm6135_vm4, %v6134_v61 }
 0x26b   : > { %5826 = vmatprep.subr.mxu1 %v6134_v61 }
 0x26d   : > { %5824 = vmatmul.mubr.msk.f32.vlgmr.msra.gmra.mxu1 %vm1072_vm3, %v1047_v8 }
 0x26e   : > { %5827 = vmatpush3.xpose.msk.msra.mxu1 %vm1072_vm3, %v998_v15  ;;  %5828 = vmatprep.mubr.msk.f32.mxu1 %vm6135_vm4, %v6134_v61 }
 0x26f   : > { %5831 = vmatprep.subr.mxu1 %v6134_v61 }
 0x271   : > { %5829 = vmatmul.mubr.msk.f32.vlgmr.msra.gmra.mxu1 %vm1072_vm3, %v1047_v8 }
 0x272   : > { %5832 = vmatpush3.xpose.msk.msra.mxu1 %vm1072_vm3, %v999_v16  ;;  %5833 = vmatprep.mubr.msk.f32.mxu1 %vm6135_vm4, %v6134_v61 }
 0x273   : > { %5841 = vmatprep.subr.mxu1 %v6134_v61 }
 0x275   : > { %5834 = vmatmul.mubr.msk.f32.vlgmr.msra.gmra.mxu1 %vm1072_vm3, %v1047_v8 }
 0x276   : > { %5842 = vmatpush3.xpose.msk.msra.mxu1 %vm1072_vm3, %v1005_v17  ;;  %5843 = vmatprep.mubr.msk.f32.mxu1 %vm6135_vm4, %v6134_v61 }
 0x277   : > { %5851 = vmatprep.subr.mxu1 %v6134_v61 }
 0x279   : > { %5844 = vmatmul.mubr.msk.f32.vlgmr.msra.gmra.mxu1 %vm1072_vm3, %v1047_v8 }
 0x27a   : > { %5852 = vmatpush3.xpose.msk.msra.mxu1 %vm1072_vm3, %v1007_v18  ;;  %5853 = vmatprep.mubr.msk.f32.mxu1 %vm6135_vm4, %v6134_v61 }
 0x27b   : > { %5861 = vmatprep.subr.mxu1 %v6134_v61 }
 0x27d   : > { %5854 = vmatmul.mubr.msk.f32.vlgmr.msra.gmra.mxu1 %vm1072_vm3, %v1047_v8 }
 0x27e   : > { %5863 = vmatprep.mubr.msk.f32.mxu1 %vm6135_vm4, %v6134_v61 }
 0x319   : > { %v1145_v19 = vpop.f32.mrf.mxu1  ;;  %v1777_v20 = vpop.f32.mrf.mxu0 }
 0x31a   : > { %v1146_v37 = vadd.f32 %v5408_v33, %v1145_v19  ;;  %v1778_v52 = vadd.f32 %v5432_v47, %v1777_v20 }
 0x31b   : > { %v5800_v21 = vpop.f32.mrf.mxu1  ;;  %v5840_v22 = vpop.f32.mrf.mxu0 }
 0x31d   : > { %v1218_v23 = vpop.f32.mrf.mxu1  ;;  %v6700_v24 = vpop.f32.mrf.mxu0 }
 0x31e   : > { %v1219_v43 = vadd.f32 %v5409_v39, %v1218_v23 }
 0x31f   : > { %v5805_v25 = vpop.f32.mrf.mxu1  ;;  %v5850_v26 = vpop.f32.mrf.mxu0 }
 0x321   : > { %v1291_v27 = vpop.f32.mrf.mxu1 }
 0x322   : > { %v1292_v50 = vadd.f32 %v5410_v45, %v1291_v27 }
 0x323   : > { %v5810_v28 = vpop.f32.mrf.mxu1 }
 0x325   : > { %v1364_v29 = vpop.f32.mrf.mxu1 }
 0x326   : > { %v1365_v58 = vadd.f32 %v5411_v53, %v1364_v29 }
 0x327   : > { %v5815_v30 = vpop.f32.mrf.mxu1 }
 0x329   : > { %v1461_v32 = vpop.f32.mrf.mxu1 }
 0x32a   : > { %v1462_v34 = vadd.f32 %v5420_v31, %v1461_v32 }
 0x32b   : > { %v5820_v35 = vpop.f32.mrf.mxu1 }
 0x32c   : > { %5857 = vmatpush3.xpose.msk.msra.mxu0 %vm2000_vm5, %v1462_v34 }
 0x32d   : > { %v1534_v38 = vpop.f32.mrf.mxu1  ;;  %5866 = vmatprep.subr.mxu0 %v6134_v61 }
 0x32e   : > { %v1535_v40 = vadd.f32 %v5421_v36, %v1534_v38  ;;  %v5434_v38 = vld [vmem:[%s7159_s12 + $0x2] ss:$0 sm:$0xff] }
 0x32f   : > { %v5825_v41 = vpop.f32.mrf.mxu1  ;;  %5859 = vmatmul.mubr.msk.f32.vlgmr.msra.gmra.mxu0 %vm2000_vm5, %v1146_v37 }
 0x330   : > { %5862 = vmatpush3.xpose.msk.msra.mxu1 %vm2000_vm5, %v1535_v40  ;;  %5868 = vmatprep.mubr.msk.f32.mxu0 %vm6135_vm4, %v6134_v61  ;;  %v1924_v41 = vadd.f32 %v5434_v38, %v6700_v24  ;;  %v5467_v38 = vld [vmem:[%s7165_s18] ss:$0 sm:$0xff] }
 0x331   : > { %v1607_v44 = vpop.f32.mrf.mxu1  ;;  %5871 = vmatprep.subr.mxu1 %v6134_v61 }
 0x332   : > { %v1608_v46 = vadd.f32 %v5422_v42, %v1607_v44  ;;  %v5435_v42 = vld [vmem:[%s7159_s12 + $0x3] ss:$0 sm:$0xff] }
 0x333   : > { %v5830_v48 = vpop.f32.mrf.mxu1  ;;  %5864 = vmatmul.mubr.msk.f32.vlgmr.msra.gmra.mxu1 %vm2000_vm5, %v1219_v43 }
 0x334   : > { %5867 = vmatpush3.xpose.msk.msra.mxu0 %vm2000_vm5, %v1608_v46  ;;  %5873 = vmatprep.mubr.msk.f32.mxu1 %vm6135_vm4, %v6134_v61 }
 0x335   : > { %v1680_v51 = vpop.f32.mrf.mxu1  ;;  %5876 = vmatprep.subr.mxu0 %v6134_v61 }
 0x336   : > { %v1681_v55 = vadd.f32 %v5423_v49, %v1680_v51  ;;  %v1012_v49 = vld [vmem:[%s7160_s13] sm:$0xff]  ;;  %v1014_v51 = vld [vmem:[%s7160_s13 + $0x10] sm:$0xff] }
 0x337   : > { %v5835_v56 = vpop.f32.mrf.mxu1  ;;  %5869 = vmatmul.mubr.msk.f32.vlgmr.msra.gmra.mxu0 %vm2000_vm5, %v1292_v50  ;;  %v1013_v50 = vld [vmem:[%s7160_s13 + $0x8] sm:$0xff] }
 0x338   : > { %5872 = vmatpush3.xpose.msk.msra.mxu1 %vm2000_vm5, %v1681_v55  ;;  %5877 = vmatpush3.msk.msra.mxu0 %vm2354_vm6, %v1778_v52  ;;  %v1015_v55 = vld [vmem:[%s7160_s13 + $0x18] sm:$0xff] }
 0x339   : > { %v1850_v59 = vpop.f32.mrf.mxu1  ;;  %5881 = vmatprep.subr.mxu1 %v6134_v61  ;;  %5878 = vmatprep.mubr.msk.f32.mxu0 %vm6135_vm4, %v6134_v61 }
 0x33a   : > { %v1851_v60 = vadd.f32 %v5433_v57, %v1850_v59  ;;  %5886 = vmatprep.subr.mxu0 %v6134_v61 }
 0x33b   : > { %v5845_v62 = vpop.f32.mrf.mxu1  ;;  %5874 = vmatmul.mubr.msk.f32.vlgmr.msra.gmra.mxu1 %vm2000_vm5, %v1365_v58 }
 0x33c   : > { %5882 = vmatpush3.msk.msra.mxu1 %vm2354_vm6, %v1851_v60  ;;  %5883 = vmatprep.mubr.msk.f32.mxu1 %vm6135_vm4, %v6134_v61 }
 0x33d   : > { %v6755_v63 = vpop.f32.mrf.mxu1  ;;  %5891 = vmatprep.subr.mxu1 %v6134_v61 }
 0x33e   : > { %v1997_v45 = vadd.f32 %v5435_v42, %v6755_v63 }
 0x33f   : > { %v5855_v0 = vpop.f32.mrf.mxu1 }
 0x3ef   : > { %v2073_v1 = vpop.f32.mrf.mxu0 }
 0x3f0   : > { %v2306_v2 = vsel %vm2305_vm7, %v2073_v1, -inf }
 0x3f1   : > { %2307 = vmax.xlane.f32.xlu1 %v2306_v2  ;;  %v5860_v3 = vpop.f32.mrf.mxu0 }
 0x3f3   : > { %v2149_v4 = vpop.f32.mrf.mxu1 }
 0x3f4   : > { %v2309_v5 = vsel %vm2305_vm7, %v2149_v4, -inf }
 0x3f5   : > { %2310 = vmax.xlane.f32.xlu1 %v2309_v5  ;;  %v5865_v6 = vpop.f32.mrf.mxu1 }
 0x3f7   : > { %v2225_v7 = vpop.f32.mrf.mxu0 }
 0x3f8   : > { %v2312_v8 = vsel %vm2305_vm7, %v2225_v7, -inf }
 0x3f9   : > { %2313 = vmax.xlane.f32.xlu0 %v2312_v8  ;;  %v5870_v9 = vpop.f32.mrf.mxu0 }
 0x3fb   : > { %v2301_v10 = vpop.f32.mrf.mxu1 }
 0x3fc   : > { %v2315_v11 = vsel %vm2305_vm7, %v2301_v10, -inf }
 0x3fd   : > { %2316 = vmax.xlane.f32.xlu1 %v2315_v11  ;;  %v5875_v12 = vpop.f32.mrf.mxu1 }
 0x47a   : > { %v2308_v13 = vpop.xlane.xlu1 %2307 }
 0x47b   : > { %v2318_v14 = vsub.f32 %v2073_v1, %v2308_v13 }
 0x47d   : > { %v2322_v15 = vmul.f32 1.442695, %v2318_v14  ;;  %v5464_v14 = vld [vmem:[%s7161_s14] ss:$0 sm:$0xff] }
 0x47e   : > { %v2311_v16 = vpop.xlane.xlu1 %2310 }
 0x47f   : > { %6088 = vpow2.f32 %v2322_v15  ;;  %v2319_v17 = vsub.f32 %v2149_v4, %v2311_v16 }
 0x481   : > { %v2324_v18 = vmul.f32 1.442695, %v2319_v17 }
 0x482   : > { %v2314_v19 = vpop.xlane.xlu0 %2313 }
 0x483   : > { %6090 = vpow2.f32 %v2324_v18  ;;  %v2320_v20 = vsub.f32 %v2225_v7, %v2314_v19 }
 0x485   : > { %v2326_v21 = vmul.f32 1.442695, %v2320_v20 }
 0x486   : > { %v2317_v22 = vpop.xlane.xlu1 %2316 }
 0x487   : > { %6092 = vpow2.f32 %v2326_v21  ;;  %v2321_v23 = vsub.f32 %v2301_v10, %v2317_v22 }
 0x489   : > { %v2328_v25 = vmul.f32 1.442695, %v2321_v23  ;;  %v2995_v23 = vld [vmem:[%s7164_s17 + $0x18] sm:$0xff] }
 0x48b   : > { %6094 = vpow2.f32 %v2328_v25  ;;  %v2993_v25 = vld [vmem:[%s7164_s17 + $0x8] sm:$0xff] }
 0x48c   : > { %v6089_v26 = vpop.eup %6088 }
 0x48d   : > { %v2330_v27 = vsel %vm2305_vm7, %v6089_v26, 0.0 }
 0x48e   : > { %2331 = vadd.xlane.f32.xlu0 %v2330_v27 }
 0x490   : > { %v6091_v28 = vpop.eup %6090 }
 0x491   : > { %v2333_v29 = vsel %vm2305_vm7, %v6091_v28, 0.0 }
 0x492   : > { %2334 = vadd.xlane.f32.xlu1 %v2333_v29 }
 0x494   : > { %v6093_v30 = vpop.eup %6092 }
 0x495   : > { %v2336_v31 = vsel %vm2305_vm7, %v6093_v30, 0.0 }
 0x496   : > { %2337 = vadd.xlane.f32.xlu0 %v2336_v31  ;;  %v5465_v31 = vld [vmem:[%s7162_s15] ss:$0 sm:$0xff] }
 0x498   : > { %v6095_v32 = vpop.eup %6094 }
 0x499   : > { %v2339_v33 = vsel %vm2305_vm7, %v6095_v32, 0.0 }
 0x49a   : > { %2340 = vadd.xlane.f32.xlu1 %v2339_v33  ;;  %v5466_v33 = vld [vmem:[%s7163_s16] ss:$0 sm:$0xff] }
 0x517   : > { %v2332_v34 = vpop.xlane.xlu0 %2331 }
 0x518   : > { %6096 = vrcp.f32 %v2332_v34 }
 0x51b   : > { %v2335_v35 = vpop.xlane.xlu1 %2334 }
 0x51c   : > { %6098 = vrcp.f32 %v2335_v35 }
 0x51f   : > { %v2338_v36 = vpop.xlane.xlu0 %2337 }
 0x520   : > { %6100 = vrcp.f32 %v2338_v36  ;;  %v3078_v36 = vld [vmem:[%s7166_s19 + $0x8] sm:$0xff] }
 0x523   : > { %v2341_v37 = vpop.xlane.xlu1 %2340 }
 0x524   : > { %6102 = vrcp.f32 %v2341_v37  ;;  %v3077_v37 = vld [vmem:[%s7166_s19] sm:$0xff] }
 0x525   : > { %v6097_v39 = vpop.eup %6096 }
 0x526   : > { %v2346_v40 = vmul.f32 %v6097_v39, %v6089_v26  ;;  %v2992_v26 = vld [vmem:[%s7164_s17] sm:$0xff] }
 0x528   : > { %5879 = vmatmul.mubr.msk.f32.vlgmr.msra.gmra.mxu0 %vm2350_vm8, %v2346_v40 }
 0x529   : > { %v6099_v43 = vpop.eup %6098  ;;  %5887 = vmatpush3.msk.msra.mxu0 %vm2354_vm6, %v1924_v41  ;;  %5888 = vmatprep.mubr.msk.f32.mxu0 %vm6135_vm4, %v6134_v61 }
 0x52a   : > { %v2347_v44 = vmul.f32 %v6099_v43, %v6091_v28  ;;  %5896 = vmatprep.subr.mxu0 %v6134_v61 }
 0x52c   : > { %5884 = vmatmul.mubr.msk.f32.vlgmr.msra.gmra.mxu1 %vm2350_vm8, %v2347_v44  ;;  %v5470_v44 = vld [vmem:[%s7167_s20] ss:$0 sm:$0xff] }
 0x52d   : > { %v6101_v24 = vpop.eup %6100  ;;  %5892 = vmatpush3.msk.msra.mxu1 %vm2354_vm6, %v1997_v45  ;;  %5893 = vmatprep.mubr.msk.f32.mxu1 %vm6135_vm4, %v6134_v61 }
 0x52e   : > { %v2348_v46 = vmul.f32 %v6101_v24, %v6093_v30  ;;  %5901 = vmatprep.subr.mxu1 %v6134_v61 }
 0x530   : > { %5889 = vmatmul.mubr.msk.f32.vlgmr.msra.gmra.mxu0 %vm2350_vm8, %v2348_v46 }
 0x531   : > { %v6103_v47 = vpop.eup %6102  ;;  %5898 = vmatprep.mubr.msk.f32.mxu0 %vm6135_vm4, %v6134_v61  ;;  %5897 = vmatpush3.msra.mxu0 %v1012_v49 }
 0x532   : > { %v2349_v48 = vmul.f32 %v6103_v47, %v6095_v32  ;;  %5906 = vmatprep.subr.mxu0 %v6134_v61 }
 0x534   : > { %5894 = vmatmul.mubr.msk.f32.vlgmr.msra.gmra.mxu1 %vm2350_vm8, %v2349_v48 }
 0x535   : > { %5903 = vmatprep.mubr.msk.f32.mxu1 %vm6135_vm4, %v6134_v61  ;;  %5902 = vmatpush3.msra.mxu1 %v1013_v50 }
 0x536   : > { %5911 = vmatprep.subr.mxu1 %v6134_v61 }
 0x5e8   : > { %v2424_v52 = vpop.f32.mrf.mxu0 }
 0x5e9   : > { %5899 = vmatmul.mubr.msk.f32.vlgmr.msra.gmra.mxu0 %vm2000_vm5, %v2424_v52 }
 0x5ea   : > { %v5880_v53 = vpop.f32.mrf.mxu0  ;;  %5907 = vmatpush3.msra.mxu0 %v1014_v51  ;;  %5908 = vmatprep.mubr.msk.f32.mxu0 %vm6135_vm4, %v6134_v61 }
 0x5eb   : > { %5916 = vmatprep.subr.mxu0 %v6134_v61  ;;  %v5471_v53 = vld [vmem:[%s7154_s7 + $0x20] sm:$0xff] }
 0x5ec   : > { %v2500_v56 = vpop.f32.mrf.mxu1 }
 0x5ed   : > { %5904 = vmatmul.mubr.msk.f32.vlgmr.msra.gmra.mxu1 %vm2000_vm5, %v2500_v56 }
 0x5ee   : > { %v5885_v57 = vpop.f32.mrf.mxu1  ;;  %5912 = vmatpush3.msra.mxu1 %v1015_v55  ;;  %5913 = vmatprep.mubr.msk.f32.mxu1 %vm6135_vm4, %v6134_v61  ;;  %v5472_v55 = vld [vmem:[%s7154_s7 + $0x28] sm:$0xff] }
 0x5ef   : > { %5927 = vmatprep.subr.mxu1 %v6134_v61 }
 0x5f0   : > { %v2576_v58 = vpop.f32.mrf.mxu0 }
 0x5f1   : > { %5909 = vmatmul.mubr.msk.f32.vlgmr.msra.gmra.mxu0 %vm2000_vm5, %v2576_v58 }
 0x5f2   : > { %v5890_v59 = vpop.f32.mrf.mxu0  ;;  %5924 = vmatprep.mubr.msk.f32.mxu0 %vm6135_vm4, %v6134_v61  ;;  %5917 = vmatpush3.msra.mxu0 %v2995_v23 }
 0x5f3   : > { %5918 = vmatprep.subr.mxu0 %v6134_v61 }
 0x5f4   : > { %v2652_v60 = vpop.f32.mrf.mxu1 }
 0x5f5   : > { %5914 = vmatmul.mubr.msk.f32.vlgmr.msra.gmra.mxu1 %vm2000_vm5, %v2652_v60  ;;  %v5502_v60 = vld [vmem:[%s7185_s23 + $0x1] ss:$0 sm:$0xff] }
 0x5f6   : > { %v5895_v62 = vpop.f32.mrf.mxu1  ;;  %5931 = vmatprep.mubr.msk.f32.mxu1 %vm6135_vm4, %v6134_v61  ;;  %5928 = vmatpush3.msra.mxu1 %v3078_v36  ;;  %v5506_v36 = vld [vmem:[%s7155_s8 + $0x6] ss:$0 sm:$0xff] }
 0x5f7   : > { %5929 = vmatprep.subr.mxu1 %v6134_v61 }
 0x5f8   : > { %5930 = vmatpush3.msra.mxu1 %v3077_v37  ;;  %v5507_v37 = vld [vmem:[%s7155_s8 + $0x7] ss:$0 sm:$0xff] }
 0x5f9   : > { %5934 = vmatprep.subr.mxu1 %v6134_v61 }
 0x6a9   : > { %v2725_v63 = vpop.f32.mrf.mxu0 }
 0x6aa   : > { %v2948_v5 = vsel %vm1019_vm2, %v2725_v63, 0.0  ;;  %v5503_v63 = vld [vmem:[%s7153_s6 + $0x1] ss:$0 sm:$0xff] }
 0x6ab   : > { %v5900_v0 = vpop.f32.mrf.mxu0 }
 0x6ad   : > { %v2798_v1 = vpop.f32.mrf.mxu1 }
 0x6ae   : > { %v2949_v3 = vsel %vm1019_vm2, %v2798_v1, 0.0 }
 0x6af   : > { %v5905_v2 = vpop.f32.mrf.mxu1  ;;  %v2950_v7 = vadd.f32 %v2949_v3, %v2948_v5  ;;  %v5474_v3 = vld [vmem:[%s7154_s7 + $0x38] sm:$0xff]  ;;  %v5480_v5 = vld [vmem:[%s7156_s9 + $0x28] sm:$0xff] }
 0x6b0   : > { %v5473_v2 = vld [vmem:[%s7154_s7 + $0x30] sm:$0xff] }
 0x6b1   : > { %v2871_v4 = vpop.f32.mrf.mxu0 }
 0x6b2   : > { %v2951_v6 = vsel %vm1019_vm2, %v2871_v4, 0.0  ;;  %v5479_v4 = vld [vmem:[%s7156_s9 + $0x20] sm:$0xff] }
 0x6b3   : > { %v5910_v8 = vpop.f32.mrf.mxu0  ;;  %v2952_v9 = vadd.f32 %v2951_v6, %v2950_v7  ;;  %v5481_v6 = vld [vmem:[%s7156_s9 + $0x30] sm:$0xff]  ;;  %v5482_v7 = vld [vmem:[%s7156_s9 + $0x38] sm:$0xff] }
 0x6b4   : > { %v5487_v8 = vld [vmem:[%s7158_s11 + $0x20] sm:$0xff] }
 0x6b5   : > { %v2944_v10 = vpop.f32.mrf.mxu1 }
 0x6b6   : > { %v2953_v11 = vsel %vm1019_vm2, %v2944_v10, 0.0  ;;  %v5489_v10 = vld [vmem:[%s7158_s11 + $0x30] sm:$0xff] }
 0x6b7   : > { %v2954_v12 = vadd.f32 %v2953_v11, %v2952_v9  ;;  %v5915_v13 = vpop.f32.mrf.mxu1  ;;  %v5488_v9 = vld [vmem:[%s7158_s11 + $0x28] sm:$0xff]  ;;  %v5490_v11 = vld [vmem:[%s7158_s11 + $0x38] sm:$0xff] }
 0x6b9   : > { %v2955_v15 = vadd.f32 %v2954_v12, %v6586_v54  ;;  %v2994_v54 = vld [vmem:[%s7164_s17 + $0x10] sm:$0xff] }
 0x6ba   : > { %5919 = vmatpush3.msra.mxu0 %v2994_v54  ;;  %v5504_v54 = vld [vmem:[%s7155_s8 + $0x4] ss:$0 sm:$0xff] }
 0x6bb   : > { %v2962_v16 = vadd.f32 %v5464_v14, %v2955_v15  ;;  %5920 = vmatprep.subr.mxu0 %v6134_v61 }
 0x6bc   : > { %5921 = vmatpush3.msra.mxu0 %v2993_v25  ;;  %v5505_v25 = vld [vmem:[%s7155_s8 + $0x5] ss:$0 sm:$0xff] }
 0x6bd   : > { %v2965_v17 = vsel %vm1019_vm2, %v2962_v16, 0.0  ;;  %5922 = vmatprep.subr.mxu0 %v6134_v61 }
 0x6be   : > { %2966 = vadd.xlane.f32.xlu0 %v2965_v17  ;;  %5923 = vmatpush3.msra.mxu0 %v2992_v26 }
 0x6bf   : > { %5939 = vmatprep.subr.mxu0 %v6134_v61 }
 0x747   : > { %v2967_v18 = vpop.xlane.xlu0 %2966 }
 0x748   : > { %v2968_v19 = vmul.f32 0.03125, %v2967_v18 }
 0x74a   : > { %v2969_v20 = vsub.f32 %v2962_v16, %v2968_v19 }
 0x74c   : > { %v2970_v21 = vmul.f32 %v2969_v20, %v2969_v20 }
 0x74e   : > { %v2971_v22 = vsel %vm1019_vm2, %v2970_v21, 0.0  ;;  %v5517_v21 = vld [vmem:[%s7157_s10 + $0x5] ss:$0 sm:$0xff] }
 0x74f   : > { %2972 = vadd.xlane.f32.xlu1 %v2971_v22 }
 0x7d8   : > { %v2973_v27 = vpop.xlane.xlu1 %2972 }
 0x7d9   : > { %v2974_v28 = vmul.f32 0.03125, %v2973_v27 }
 0x7db   : > { %v2975_v29 = vadd.f32 1e-05, %v2974_v28 }
 0x7dd   : > { %6104 = vrsqrt.f32 %v2975_v29 }
 0x7ea   : > { %v6105_v30 = vpop.eup %6104 }
 0x7eb   : > { %v2977_v32 = vmul.f32 %v6105_v30, %v2969_v20  ;;  %v5516_v20 = vld [vmem:[%s7157_s10 + $0x4] ss:$0 sm:$0xff]  ;;  %v5518_v30 = vld [vmem:[%s7157_s10 + $0x6] ss:$0 sm:$0xff] }
 0x7ed   : > { %v2984_v34 = vmul.f32 %v5465_v31, %v2977_v32  ;;  %v5519_v31 = vld [vmem:[%s7157_s10 + $0x7] ss:$0 sm:$0xff] }
 0x7ef   : > { %v2991_v35 = vadd.f32 %v5466_v33, %v2984_v34 }
 0x7f1   : > { %5925 = vmatmul.mubr.msk.f32.vlgmr.msra.gmra.mxu0 %vm1072_vm3, %v2991_v35 }
 0x7f2   : > { %5941 = vmatprep.mubr.msk.f32.mxu0 %vm6135_vm4, %v6134_v61  ;;  %5940 = vmatpush3.xpose.msk.msra.mxu0 %vm1072_vm3, %v5472_v55 }
 0x7f3   : > { %5949 = vmatprep.subr.mxu0 %v6134_v61 }
 0x8b1   : > { %v3072_v39 = vpop.f32.mrf.mxu0 }
 0x8b2   : > { %v3073_v40 = vadd.f32 %v5467_v38, %v3072_v39 }
 0x8b3   : > { %v5926_v41 = vpop.f32.mrf.mxu0 }
 0x8b4   : > { %v3076_v42 = vmax.f32 %v3073_v40, 0.0 }
 0x8b6   : > { %5932 = vmatmul.mubr.msk.f32.vlgmr.msra.gmra.mxu1 %vm3079_vm9, %v3076_v42  ;;  %v5528_v42 = vld [vmem:[%s7159_s12 + $0x4] ss:$0 sm:$0xff] }
 0x8b7   : > { %5936 = vmatprep.mubr.msk.f32.mxu1 %vm6135_vm4, %v6134_v61  ;;  %5935 = vmatpush3.xpose.msk.msra.mxu1 %vm1072_vm3, %v5471_v53 }
 0x8b8   : > { %5944 = vmatprep.subr.mxu1 %v6134_v61 }
 0x976   : > { %v3149_v43 = vpop.f32.mrf.mxu1 }
 0x977   : > { %v3153_v45 = vadd.f32 %v3149_v43, %v2962_v16  ;;  %v5529_v43 = vld [vmem:[%s7159_s12 + $0x5] ss:$0 sm:$0xff] }
 0x978   : > { %v5933_v24 = vpop.f32.mrf.mxu1 }
 0x979   : > { %v6870_v46 = vadd.f32 %v5470_v44, %v3153_v45 }
 0x97b   : > { %v3203_v47 = vsel %vm1019_vm2, %v6870_v46, 0.0 }
 0x97c   : > { %3204 = vadd.xlane.f32.xlu0 %v3203_v47 }
 0xa05   : > { %v3205_v48 = vpop.xlane.xlu0 %3204 }
 0xa06   : > { %v3206_v49 = vmul.f32 0.03125, %v3205_v48 }
 0xa08   : > { %v3207_v50 = vsub.f32 %v6870_v46, %v3206_v49 }
 0xa0a   : > { %v3208_v51 = vmul.f32 %v3207_v50, %v3207_v50 }
 0xa0c   : > { %v3209_v52 = vsel %vm1019_vm2, %v3208_v51, 0.0 }
 0xa0d   : > { %3210 = vadd.xlane.f32.xlu1 %v3209_v52 }
 0xa96   : > { %v3211_v56 = vpop.xlane.xlu1 %3210 }
 0xa97   : > { %v3212_v57 = vmul.f32 0.03125, %v3211_v56 }
 0xa99   : > { %v3213_v58 = vadd.f32 1e-05, %v3212_v57 }
 0xa9b   : > { %6106 = vrsqrt.f32 %v3213_v58 }
 0xaa8   : > { %v6107_v59 = vpop.eup %6106 }
 0xaa9   : > { %v3215_v62 = vmul.f32 %v6107_v59, %v3207_v50 }
 0xaab   : > { %v3222_v0 = vmul.f32 %v5502_v60, %v3215_v62 }
 0xaad   : > { %v3229_v1 = vadd.f32 %v5503_v63, %v3222_v0 }
 0xaaf   : > { %5937 = vmatmul.mubr.msk.f32.vlgmr.msra.gmra.mxu1 %vm1072_vm3, %v3229_v1  ;;  %5942 = vmatmul.mubr.msk.f32.vlgmr.msra.gmra.mxu0 %vm1072_vm3, %v3229_v1 }
 0xab0   : > { %5945 = vmatpush3.xpose.msk.msra.mxu1 %vm1072_vm3, %v5473_v2  ;;  %5950 = vmatpush3.xpose.msk.msra.mxu0 %vm1072_vm3, %v5474_v3 }
 0xab1   : > { %5946 = vmatprep.mubr.msk.f32.mxu1 %vm6135_vm4, %v6134_v61  ;;  %5951 = vmatprep.mubr.msk.f32.mxu0 %vm6135_vm4, %v6134_v61 }
 0xab2   : > { %5954 = vmatprep.subr.mxu1 %v6134_v61  ;;  %5959 = vmatprep.subr.mxu0 %v6134_v61 }
 0xab3   : > { %5947 = vmatmul.mubr.msk.f32.vlgmr.msra.gmra.mxu1 %vm1072_vm3, %v3229_v1  ;;  %5952 = vmatmul.mubr.msk.f32.vlgmr.msra.gmra.mxu0 %vm1072_vm3, %v3229_v1 }
 0xab4   : > { %5955 = vmatpush3.xpose.msk.msra.mxu1 %vm1072_vm3, %v5479_v4  ;;  %5960 = vmatpush3.xpose.msk.msra.mxu0 %vm1072_vm3, %v5480_v5 }
 0xab5   : > { %5956 = vmatprep.mubr.msk.f32.mxu1 %vm6135_vm4, %v6134_v61  ;;  %5961 = vmatprep.mubr.msk.f32.mxu0 %vm6135_vm4, %v6134_v61 }
 0xab6   : > { %5964 = vmatprep.subr.mxu1 %v6134_v61  ;;  %5969 = vmatprep.subr.mxu0 %v6134_v61 }
 0xab7   : > { %5957 = vmatmul.mubr.msk.f32.vlgmr.msra.gmra.mxu1 %vm1072_vm3, %v3229_v1  ;;  %5962 = vmatmul.mubr.msk.f32.vlgmr.msra.gmra.mxu0 %vm1072_vm3, %v3229_v1 }
 0xab8   : > { %5965 = vmatpush3.xpose.msk.msra.mxu1 %vm1072_vm3, %v5481_v6  ;;  %5970 = vmatpush3.xpose.msk.msra.mxu0 %vm1072_vm3, %v5482_v7 }
 0xab9   : > { %5966 = vmatprep.mubr.msk.f32.mxu1 %vm6135_vm4, %v6134_v61  ;;  %5971 = vmatprep.mubr.msk.f32.mxu0 %vm6135_vm4, %v6134_v61 }
 0xaba   : > { %5974 = vmatprep.subr.mxu1 %v6134_v61  ;;  %5979 = vmatprep.subr.mxu0 %v6134_v61 }
 0xabb   : > { %5967 = vmatmul.mubr.msk.f32.vlgmr.msra.gmra.mxu1 %vm1072_vm3, %v3229_v1  ;;  %5972 = vmatmul.mubr.msk.f32.vlgmr.msra.gmra.mxu0 %vm1072_vm3, %v3229_v1 }
 0xabc   : > { %5975 = vmatpush3.xpose.msk.msra.mxu1 %vm1072_vm3, %v5487_v8  ;;  %5980 = vmatpush3.xpose.msk.msra.mxu0 %vm1072_vm3, %v5488_v9 }
 0xabd   : > { %5976 = vmatprep.mubr.msk.f32.mxu1 %vm6135_vm4, %v6134_v61  ;;  %5981 = vmatprep.mubr.msk.f32.mxu0 %vm6135_vm4, %v6134_v61 }
 0xabe   : > { %5984 = vmatprep.subr.mxu1 %v6134_v61  ;;  %5989 = vmatprep.subr.mxu0 %v6134_v61 }
 0xabf   : > { %5977 = vmatmul.mubr.msk.f32.vlgmr.msra.gmra.mxu1 %vm1072_vm3, %v3229_v1  ;;  %5982 = vmatmul.mubr.msk.f32.vlgmr.msra.gmra.mxu0 %vm1072_vm3, %v3229_v1 }
 0xac0   : > { %5985 = vmatpush3.xpose.msk.msra.mxu1 %vm1072_vm3, %v5489_v10  ;;  %5990 = vmatpush3.xpose.msk.msra.mxu0 %vm1072_vm3, %v5490_v11 }
 0xac1   : > { %5986 = vmatprep.mubr.msk.f32.mxu1 %vm6135_vm4, %v6134_v61  ;;  %5991 = vmatprep.mubr.msk.f32.mxu0 %vm6135_vm4, %v6134_v61 }
 0xac2   : > { %5994 = vmatprep.subr.mxu1 %v6134_v61  ;;  %5999 = vmatprep.subr.mxu0 %v6134_v61 }
 0xac3   : > { %5987 = vmatmul.mubr.msk.f32.vlgmr.msra.gmra.mxu1 %vm1072_vm3, %v3229_v1  ;;  %5992 = vmatmul.mubr.msk.f32.vlgmr.msra.gmra.mxu0 %vm1072_vm3, %v3229_v1 }
 0xac4   : > { %5996 = vmatprep.mubr.msk.f32.mxu1 %vm6135_vm4, %v6134_v61  ;;  %6001 = vmatprep.mubr.msk.f32.mxu0 %vm6135_vm4, %v6134_v61 }
 0xb6f   : > { %v3326_v12 = vpop.f32.mrf.mxu1  ;;  %v3399_v13 = vpop.f32.mrf.mxu0 }
 0xb70   : > { %v3327_v32 = vadd.f32 %v5504_v54, %v3326_v12  ;;  %v3400_v33 = vadd.f32 %v5505_v25, %v3399_v13 }
 0xb71   : > { %v5938_v14 = vpop.f32.mrf.mxu1  ;;  %v5943_v15 = vpop.f32.mrf.mxu0 }
 0xb73   : > { %v3472_v16 = vpop.f32.mrf.mxu1  ;;  %v3545_v17 = vpop.f32.mrf.mxu0 }
 0xb74   : > { %v3473_v44 = vadd.f32 %v5506_v36, %v3472_v16  ;;  %v3546_v45 = vadd.f32 %v5507_v37, %v3545_v17 }
 0xb75   : > { %v5948_v18 = vpop.f32.mrf.mxu1  ;;  %v5953_v19 = vpop.f32.mrf.mxu0 }
 0xb77   : > { %v3642_v22 = vpop.f32.mrf.mxu1  ;;  %v3715_v23 = vpop.f32.mrf.mxu0 }
 0xb78   : > { %v3643_v26 = vadd.f32 %v5516_v20, %v3642_v22  ;;  %v3716_v27 = vadd.f32 %v5517_v21, %v3715_v23 }
 0xb79   : > { %v5958_v28 = vpop.f32.mrf.mxu1  ;;  %v5963_v29 = vpop.f32.mrf.mxu0 }
 0xb7a   : > { %5995 = vmatpush3.xpose.msk.msra.mxu1 %vm2000_vm5, %v3643_v26  ;;  %6000 = vmatpush3.xpose.msk.msra.mxu0 %vm2000_vm5, %v3716_v27 }
 0xb7b   : > { %v3788_v34 = vpop.f32.mrf.mxu1  ;;  %v3861_v35 = vpop.f32.mrf.mxu0  ;;  %6004 = vmatprep.subr.mxu1 %v6134_v61  ;;  %6009 = vmatprep.subr.mxu0 %v6134_v61 }
 0xb7c   : > { %v3789_v38 = vadd.f32 %v5518_v30, %v3788_v34  ;;  %v3862_v39 = vadd.f32 %v5519_v31, %v3861_v35  ;;  %v5531_v30 = vld [vmem:[%s7159_s12 + $0x7] ss:$0 sm:$0xff] }
 0xb7d   : > { %v5968_v40 = vpop.f32.mrf.mxu1  ;;  %v5973_v41 = vpop.f32.mrf.mxu0  ;;  %5997 = vmatmul.mubr.msk.f32.vlgmr.msra.gmra.mxu1 %vm2000_vm5, %v3327_v32  ;;  %6002 = vmatmul.mubr.msk.f32.vlgmr.msra.gmra.mxu0 %vm2000_vm5, %v3400_v33  ;;  %v5530_v32 = vld [vmem:[%s7159_s12 + $0x6] ss:$0 sm:$0xff] }
 0xb7e   : > { %6005 = vmatpush3.xpose.msk.msra.mxu1 %vm2000_vm5, %v3789_v38  ;;  %6010 = vmatpush3.xpose.msk.msra.mxu0 %vm2000_vm5, %v3862_v39 }
 0xb7f   : > { %v3958_v24 = vpop.f32.mrf.mxu1  ;;  %v4031_v47 = vpop.f32.mrf.mxu0  ;;  %6006 = vmatprep.mubr.msk.f32.mxu1 %vm6135_vm4, %v6134_v61  ;;  %6011 = vmatprep.mubr.msk.f32.mxu0 %vm6135_vm4, %v6134_v61 }
 0xb80   : > { %v3959_v48 = vadd.f32 %v5528_v42, %v3958_v24  ;;  %v4032_v49 = vadd.f32 %v5529_v43, %v4031_v47  ;;  %6014 = vmatprep.subr.mxu1 %v6134_v61  ;;  %6019 = vmatprep.subr.mxu0 %v6134_v61  ;;  %v5495_v42 = vld [vmem:[%s7160_s13 + $0x20] sm:$0xff]  ;;  %v5496_v43 = vld [vmem:[%s7160_s13 + $0x28] sm:$0xff]  ;;  %v5497_v24 = vld [vmem:[%s7160_s13 + $0x30] sm:$0xff] }
 0xb81   : > { %v5978_v50 = vpop.f32.mrf.mxu1  ;;  %v5983_v51 = vpop.f32.mrf.mxu0  ;;  %6007 = vmatmul.mubr.msk.f32.vlgmr.msra.gmra.mxu1 %vm2000_vm5, %v3473_v44  ;;  %6012 = vmatmul.mubr.msk.f32.vlgmr.msra.gmra.mxu0 %vm2000_vm5, %v3546_v45  ;;  %v5498_v44 = vld [vmem:[%s7160_s13 + $0x38] sm:$0xff] }
 0xb82   : > { %6015 = vmatpush3.msk.msra.mxu1 %vm2354_vm6, %v3959_v48  ;;  %6020 = vmatpush3.msk.msra.mxu0 %vm2354_vm6, %v4032_v49 }
 0xb83   : > { %v7026_v52 = vpop.f32.mrf.mxu1  ;;  %v7028_v53 = vpop.f32.mrf.mxu0  ;;  %6016 = vmatprep.mubr.msk.f32.mxu1 %vm6135_vm4, %v6134_v61  ;;  %6021 = vmatprep.mubr.msk.f32.mxu0 %vm6135_vm4, %v6134_v61 }
 0xb84   : > { %6024 = vmatprep.subr.mxu1 %v6134_v61  ;;  %6029 = vmatprep.subr.mxu0 %v6134_v61  ;;  %v4178_v35 = vadd.f32 %v5531_v30, %v7028_v53  ;;  %v4105_v37 = vadd.f32 %v5530_v32, %v7026_v52  ;;  %v5570_v30 = vld [vmem:[%s7165_s18 + $0x1] ss:$0 sm:$0xff] }
 0xb85   : > { %v5988_v55 = vpop.f32.mrf.mxu1  ;;  %v5993_v56 = vpop.f32.mrf.mxu0 }
 0xc3d   : > { %v4253_v57 = vpop.f32.mrf.mxu1  ;;  %v4329_v58 = vpop.f32.mrf.mxu0 }
 0xc3e   : > { %v4488_v59 = vsel %vm2305_vm7, %v4329_v58, -inf  ;;  %v4485_v60 = vsel %vm2305_vm7, %v4253_v57, -inf }
 0xc3f   : > { %4489 = vmax.xlane.f32.xlu1 %v4488_v59  ;;  %v6003_v62 = vpop.f32.mrf.mxu0  ;;  %4486 = vmax.xlane.f32.xlu0 %v4485_v60  ;;  %v5998_v63 = vpop.f32.mrf.mxu1 }
 0xc41   : > { %v4405_v0 = vpop.f32.mrf.mxu1  ;;  %v4481_v1 = vpop.f32.mrf.mxu0 }
 0xc42   : > { %v4494_v2 = vsel %vm2305_vm7, %v4481_v1, -inf  ;;  %v4491_v3 = vsel %vm2305_vm7, %v4405_v0, -inf }
 0xc43   : > { %4495 = vmax.xlane.f32.xlu1 %v4494_v2  ;;  %v6013_v4 = vpop.f32.mrf.mxu0  ;;  %4492 = vmax.xlane.f32.xlu0 %v4491_v3  ;;  %v6008_v5 = vpop.f32.mrf.mxu1 }
 0xcc8   : > { %v4490_v6 = vpop.xlane.xlu1 %4489  ;;  %v4487_v7 = vpop.xlane.xlu0 %4486 }
 0xcc9   : > { %v4498_v8 = vsub.f32 %v4329_v58, %v4490_v6  ;;  %v4497_v9 = vsub.f32 %v4253_v57, %v4487_v7  ;;  %v5560_v7 = vld [vmem:[%s7161_s14 + $0x1] ss:$0 sm:$0xff] }
 0xccb   : > { %v4503_v10 = vmul.f32 1.442695, %v4498_v8  ;;  %v4501_v11 = vmul.f32 1.442695, %v4497_v9 }
 0xccc   : > { %v4496_v12 = vpop.xlane.xlu1 %4495  ;;  %v4493_v13 = vpop.xlane.xlu0 %4492 }
 0xccd   : > { %6108 = vpow2.f32 %v4503_v10  ;;  %v4500_v14 = vsub.f32 %v4481_v1, %v4496_v12  ;;  %v4499_v15 = vsub.f32 %v4405_v0, %v4493_v13 }
 0xcce   : > { %6110 = vpow2.f32 %v4501_v11 }
 0xccf   : > { %v4507_v16 = vmul.f32 1.442695, %v4500_v14  ;;  %v4505_v17 = vmul.f32 1.442695, %v4499_v15 }
 0xcd1   : > { %6112 = vpow2.f32 %v4507_v16  ;;  %v5568_v16 = vld [vmem:[%s7164_s17 + $0x38] sm:$0xff] }
 0xcd2   : > { %6114 = vpow2.f32 %v4505_v17  ;;  %v5566_v17 = vld [vmem:[%s7164_s17 + $0x28] sm:$0xff] }
 0xcda   : > { %v6109_v18 = vpop.eup %6108 }
 0xcdb   : > { %v6111_v19 = vpop.eup %6110  ;;  %v4512_v20 = vsel %vm2305_vm7, %v6109_v18, 0.0 }
 0xcdc   : > { %4513 = vadd.xlane.f32.xlu1 %v4512_v20  ;;  %v4509_v21 = vsel %vm2305_vm7, %v6111_v19, 0.0 }
 0xcdd   : > { %4510 = vadd.xlane.f32.xlu0 %v4509_v21 }
 0xcde   : > { %v6113_v22 = vpop.eup %6112 }
 0xcdf   : > { %v6115_v23 = vpop.eup %6114  ;;  %v4518_v54 = vsel %vm2305_vm7, %v6113_v22, 0.0 }
 0xce0   : > { %4519 = vadd.xlane.f32.xlu1 %v4518_v54  ;;  %v4515_v25 = vsel %vm2305_vm7, %v6115_v23, 0.0 }
 0xce1   : > { %4516 = vadd.xlane.f32.xlu0 %v4515_v25  ;;  %v5564_v25 = vld [vmem:[%s7163_s16 + $0x1] ss:$0 sm:$0xff] }
 0xd65   : > { %v4514_v26 = vpop.xlane.xlu1 %4513 }
 0xd66   : > { %6116 = vrcp.f32 %v4514_v26  ;;  %v4511_v27 = vpop.xlane.xlu0 %4510 }
 0xd67   : > { %6118 = vrcp.f32 %v4511_v27 }
 0xd69   : > { %v4520_v28 = vpop.xlane.xlu1 %4519 }
 0xd6a   : > { %6120 = vrcp.f32 %v4520_v28  ;;  %v4517_v29 = vpop.xlane.xlu0 %4516  ;;  %v5573_v28 = vld [vmem:[%s7166_s19 + $0x18] sm:$0xff] }
 0xd6b   : > { %6122 = vrcp.f32 %v4517_v29  ;;  %v5572_v29 = vld [vmem:[%s7166_s19 + $0x10] sm:$0xff] }
 0xd73   : > { %v6117_v31 = vpop.eup %6116 }
 0xd74   : > { %v6119_v33 = vpop.eup %6118  ;;  %v4526_v34 = vmul.f32 %v6117_v31, %v6109_v18  ;;  %v5565_v18 = vld [vmem:[%s7164_s17 + $0x20] sm:$0xff] }
 0xd75   : > { %v4525_v36 = vmul.f32 %v6119_v33, %v6111_v19 }
 0xd76   : > { %6022 = vmatmul.mubr.msk.f32.vlgmr.msra.gmra.mxu0 %vm2350_vm8, %v4526_v34 }
 0xd77   : > { %v6121_v38 = vpop.eup %6120  ;;  %6017 = vmatmul.mubr.msk.f32.vlgmr.msra.gmra.mxu1 %vm2350_vm8, %v4525_v36  ;;  %6030 = vmatpush3.msk.msra.mxu0 %vm2354_vm6, %v4178_v35  ;;  %v5576_v36 = vld [vmem:[%s7167_s20 + $0x1] ss:$0 sm:$0xff] }
 0xd78   : > { %v6123_v39 = vpop.eup %6122  ;;  %6025 = vmatpush3.msk.msra.mxu1 %vm2354_vm6, %v4105_v37  ;;  %6026 = vmatprep.mubr.msk.f32.mxu1 %vm6135_vm4, %v6134_v61  ;;  %v4528_v40 = vmul.f32 %v6121_v38, %v6113_v22 }
 0xd79   : > { %6031 = vmatprep.mubr.msk.f32.mxu0 %vm6135_vm4, %v6134_v61  ;;  %v4527_v41 = vmul.f32 %v6123_v39, %v6115_v23  ;;  %6034 = vmatprep.subr.mxu1 %v6134_v61  ;;  %v5563_v23 = vld [vmem:[%s7162_s15 + $0x1] ss:$0 sm:$0xff] }
 0xd7a   : > { %6032 = vmatmul.mubr.msk.f32.vlgmr.msra.gmra.mxu0 %vm2350_vm8, %v4528_v40  ;;  %6039 = vmatprep.subr.mxu0 %v6134_v61 }
 0xd7b   : > { %6027 = vmatmul.mubr.msk.f32.vlgmr.msra.gmra.mxu1 %vm2350_vm8, %v4527_v41  ;;  %6041 = vmatprep.mubr.msk.f32.mxu0 %vm6135_vm4, %v6134_v61 }
 0xd7c   : > { %6035 = vmatpush3.msra.mxu1 %v5495_v42  ;;  %6036 = vmatprep.mubr.msk.f32.mxu1 %vm6135_vm4, %v6134_v61 }
 0xd7d   : > { %6044 = vmatprep.subr.mxu1 %v6134_v61  ;;  %6040 = vmatpush3.msra.mxu0 %v5496_v43 }
 0xd7e   : > { %6049 = vmatprep.subr.mxu0 %v6134_v61 }
 0xe36   : > { %v4677_v45 = vpop.f32.mrf.mxu0 }
 0xe37   : > { %v4601_v47 = vpop.f32.mrf.mxu1  ;;  %6042 = vmatmul.mubr.msk.f32.vlgmr.msra.gmra.mxu0 %vm2000_vm5, %v4677_v45 }
 0xe38   : > { %6037 = vmatmul.mubr.msk.f32.vlgmr.msra.gmra.mxu1 %vm2000_vm5, %v4601_v47  ;;  %v6023_v48 = vpop.f32.mrf.mxu0  ;;  %6050 = vmatpush3.msra.mxu0 %v5498_v44 }
 0xe39   : > { %v6018_v49 = vpop.f32.mrf.mxu1  ;;  %6045 = vmatpush3.msra.mxu1 %v5497_v24  ;;  %6046 = vmatprep.mubr.msk.f32.mxu1 %vm6135_vm4, %v6134_v61 }
 0xe3a   : > { %v4829_v50 = vpop.f32.mrf.mxu0  ;;  %6051 = vmatprep.mubr.msk.f32.mxu0 %vm6135_vm4, %v6134_v61  ;;  %6054 = vmatprep.subr.mxu1 %v6134_v61 }
 0xe3b   : > { %v4753_v51 = vpop.f32.mrf.mxu1  ;;  %6052 = vmatmul.mubr.msk.f32.vlgmr.msra.gmra.mxu0 %vm2000_vm5, %v4829_v50  ;;  %6065 = vmatprep.subr.mxu0 %v6134_v61 }
 0xe3c   : > { %6047 = vmatmul.mubr.msk.f32.vlgmr.msra.gmra.mxu1 %vm2000_vm5, %v4753_v51  ;;  %v6033_v52 = vpop.f32.mrf.mxu0  ;;  %6069 = vmatprep.mubr.msk.f32.mxu0 %vm6135_vm4, %v6134_v61 }
 0xe3d   : > { %v6028_v53 = vpop.f32.mrf.mxu1  ;;  %6062 = vmatprep.mubr.msk.f32.mxu1 %vm6135_vm4, %v6134_v61  ;;  %6055 = vmatpush3.msra.mxu1 %v5568_v16 }
 0xe3e   : > { %6056 = vmatprep.subr.mxu1 %v6134_v61  ;;  %6066 = vmatpush3.msra.mxu0 %v5573_v28 }
 0xe3f   : > { %6067 = vmatprep.subr.mxu0 %v6134_v61 }
 0xe40   : > { %6068 = vmatpush3.msra.mxu0 %v5572_v29 }
 0xef7   : > { %v4975_v55 = vpop.f32.mrf.mxu0 }
 0xef8   : > { %v4902_v56 = vpop.f32.mrf.mxu1  ;;  %v5126_v58 = vsel %vm1019_vm2, %v4975_v55, 0.0 }
 0xef9   : > { %v5125_v57 = vsel %vm1019_vm2, %v4902_v56, 0.0  ;;  %v6043_v59 = vpop.f32.mrf.mxu0 }
 0xefa   : > { %v6038_v60 = vpop.f32.mrf.mxu1  ;;  %v5127_v63 = vadd.f32 %v5126_v58, %v5125_v57 }
 0xefb   : > { %v5121_v62 = vpop.f32.mrf.mxu0 }
 0xefc   : > { %v5048_v0 = vpop.f32.mrf.mxu1  ;;  %v5130_v5 = vsel %vm1019_vm2, %v5121_v62, 0.0 }
 0xefd   : > { %v5128_v1 = vsel %vm1019_vm2, %v5048_v0, 0.0  ;;  %v6053_v2 = vpop.f32.mrf.mxu0 }
 0xefe   : > { %v5129_v3 = vadd.f32 %v5128_v1, %v5127_v63  ;;  %v6048_v4 = vpop.f32.mrf.mxu1 }
 0xf00   : > { %v5131_v6 = vadd.f32 %v5130_v5, %v5129_v3 }
 0xf02   : > { %v5132_v8 = vadd.f32 %v5131_v6, %v6870_v46  ;;  %v5567_v46 = vld [vmem:[%s7164_s17 + $0x30] sm:$0xff] }
 0xf03   : > { %6057 = vmatpush3.msra.mxu1 %v5567_v46 }
 0xf04   : > { %v5139_v9 = vadd.f32 %v5560_v7, %v5132_v8  ;;  %6058 = vmatprep.subr.mxu1 %v6134_v61 }
 0xf05   : > { %6059 = vmatpush3.msra.mxu1 %v5566_v17 }
 0xf06   : > { %v5144_v10 = vsel %vm1019_vm2, %v5139_v9, 0.0  ;;  %6060 = vmatprep.subr.mxu1 %v6134_v61 }
 0xf07   : > { %5145 = vadd.xlane.f32.xlu0 %v5144_v10  ;;  %6061 = vmatpush3.msra.mxu1 %v5565_v18 }
 0xf90   : > { %v5146_v11 = vpop.xlane.xlu0 %5145 }
 0xf91   : > { %v5147_v12 = vmul.f32 0.03125, %v5146_v11 }
 0xf93   : > { %v5148_v13 = vsub.f32 %v5139_v9, %v5147_v12 }
 0xf95   : > { %v5149_v14 = vmul.f32 %v5148_v13, %v5148_v13 }
 0xf97   : > { %v5150_v15 = vsel %vm1019_vm2, %v5149_v14, 0.0 }
 0xf98   : > { %5151 = vadd.xlane.f32.xlu1 %v5150_v15 }
0x1021   : > { %v5152_v19 = vpop.xlane.xlu1 %5151 }
0x1022   : > { %v5153_v20 = vmul.f32 0.03125, %v5152_v19 }
0x1024   : > { %v5154_v21 = vadd.f32 1e-05, %v5153_v20 }
0x1026   : > { %6124 = vrsqrt.f32 %v5154_v21 }
0x1033   : > { %v6125_v22 = vpop.eup %6124 }
0x1034   : > { %v5156_v54 = vmul.f32 %v6125_v22, %v5148_v13 }
0x1036   : > { %v5163_v26 = vmul.f32 %v5563_v23, %v5156_v54 }
0x1038   : > { %v5170_v27 = vadd.f32 %v5564_v25, %v5163_v26 }
0x103a   : > { %6063 = vmatmul.mubr.msk.f32.vlgmr.msra.gmra.mxu1 %vm1072_vm3, %v5170_v27 }
0x10fa   : > { %v5253_v31 = vpop.f32.mrf.mxu1 }
0x10fb   : > { %v5254_v32 = vadd.f32 %v5570_v30, %v5253_v31 }
0x10fc   : > { %v6064_v33 = vpop.f32.mrf.mxu1 }
0x10fd   : > { %v5257_v34 = vmax.f32 %v5254_v32, 0.0 }
0x10ff   : > { %6070 = vmatmul.mubr.msk.f32.vlgmr.msra.gmra.mxu0 %vm3079_vm9, %v5257_v34 }
0x11bf   : > { %v5330_v35 = vpop.f32.mrf.mxu0 }
0x11c0   : > { %v5334_v37 = vadd.f32 %v5330_v35, %v5139_v9 }
0x11c1   : > { %v6071_v38 = vpop.f32.mrf.mxu0 }
0x11c2   : > { %v5343_v39 = vadd.f32 %v5576_v36, %v5334_v37 }
0x11c4   : > { %5344 = vst.msk [vmem:[%s6572_s4] sm:$0x1f] %vm1019_vm2, %v5343_v39 }
0x11c5 PF: > { %s7186_s24 = sld [smem:[#allocation2_spill]] }
0x11cb   : > { %s31_s2 = sadd.s32 1, %s7186_s24  }
0x11cc   : > { %p28_p4 = scmp.ge.s32.totalorder %s31_s2, 4  }
0x11ce   :  { %30 = sbr.rel (!%p28_p4) target bundleno = 7 (0x7), region = 150 }

</bundles_post_ra>
